<compile_context>
chip_gen: v7x
topology: tpu7x:2x2x1
jax: 0.10.0
libtpu: 0.0.40
codegen_flags: <defaults>
</compile_context>

<pallas_src>
import functools
import math

import jax
import jax.numpy as jnp
from jax.experimental import pallas as pl
from jax.experimental.pallas import tpu as pltpu


def _round_up(x, m):
    return (x + m - 1) // m * m


# ----------------------------------------------------------------------------
# Kernels
# ----------------------------------------------------------------------------

def _linear_kernel(x_ref, w_ref, b_ref, h_ref):
    # H = X @ W_pad + b_lin_pad  (W kept VMEM-resident; output bf16, lane-dense)
    h = jnp.dot(x_ref[...], w_ref[...], preferred_element_type=jnp.float32)
    h_ref[...] = (h + b_ref[...]).astype(h_ref.dtype)


def _propagate_kernel(a_ref, h_ref, bg_ref, y_ref, stats_ref, acc_ref):
    # Y = relu(A_hat @ H + b_gcn), plus per-row-tile BN partial sums.
    k = pl.program_id(1)

    @pl.when(k == 0)
    def _():
        acc_ref[...] = jnp.zeros_like(acc_ref)

    acc_ref[...] += jnp.dot(a_ref[...], h_ref[...],
                            preferred_element_type=jnp.float32)

    @pl.when(k == pl.num_programs(1) - 1)
    def _():
        y = jnp.maximum(acc_ref[...] + bg_ref[...], 0.0)
        y_ref[...] = y
        hpad = y.shape[1]
        ssum = jnp.sum(y, axis=0, keepdims=True)          # (1, hpad)
        ssq = jnp.sum(y * y, axis=0, keepdims=True)       # (1, hpad)
        pad = jnp.zeros((6, hpad), jnp.float32)
        stats_ref[0] = jnp.concatenate([ssum, ssq, pad], axis=0)


def _bn_apply_kernel(y_ref, scale_ref, shift_ref, z_ref):
    z_ref[...] = y_ref[...] * scale_ref[...] + shift_ref[...]


def _pool_kernel(b_ref, z_ref, g_ref, acc_ref):
    # G = B @ Z, reduction over node tiles with VMEM accumulator.
    k = pl.program_id(0)

    @pl.when(k == 0)
    def _():
        acc_ref[...] = jnp.zeros_like(acc_ref)

    acc_ref[...] += jnp.dot(b_ref[...], z_ref[...],
                            preferred_element_type=jnp.float32)

    @pl.when(k == pl.num_programs(0) - 1)
    def _():
        g_ref[...] = acc_ref[...]


# ----------------------------------------------------------------------------
# pallas_call wrappers
# ----------------------------------------------------------------------------

def linear_pallas(x, w_pad, b_pad, *, tile):
    n_pad, din = x.shape
    hpad = w_pad.shape[1]
    return pl.pallas_call(
        _linear_kernel,
        out_shape=jax.ShapeDtypeStruct((n_pad, hpad), jnp.bfloat16),
        grid=(n_pad // tile,),
        in_specs=[
            pl.BlockSpec((tile, din), lambda i: (i, 0)),
            pl.BlockSpec((din, hpad), lambda i: (0, 0)),
            pl.BlockSpec((1, hpad), lambda i: (0, 0)),
        ],
        out_specs=pl.BlockSpec((tile, hpad), lambda i: (i, 0)),
        compiler_params=pltpu.CompilerParams(
            dimension_semantics=("parallel",)),
    )(x, w_pad, b_pad)


def propagate_pallas(a_bf16, h_bf16, b_gcn_pad, *, tile):
    n_pad = a_bf16.shape[0]
    hpad = h_bf16.shape[1]
    t = n_pad // tile
    return pl.pallas_call(
        _propagate_kernel,
        out_shape=(
            jax.ShapeDtypeStruct((n_pad, hpad), jnp.float32),   # Y (pre-BN)
            jax.ShapeDtypeStruct((t, 8, hpad), jnp.float32),    # BN partials
        ),
        grid=(t, t),
        in_specs=[
            pl.BlockSpec((tile, tile), lambda i, k: (i, k)),    # A_hat tile (bf16)
            pl.BlockSpec((tile, hpad), lambda i, k: (k, 0)),    # H k-tile (bf16)
            pl.BlockSpec((1, hpad), lambda i, k: (0, 0)),       # b_gcn (resident)
        ],
        out_specs=(
            pl.BlockSpec((tile, hpad), lambda i, k: (i, 0)),
            pl.BlockSpec((1, 8, hpad), lambda i, k: (i, 0, 0)),
        ),
        scratch_shapes=[pltpu.VMEM((tile, hpad), jnp.float32)],
        compiler_params=pltpu.CompilerParams(
            dimension_semantics=("parallel", "arbitrary")),
    )(a_bf16, h_bf16, b_gcn_pad)


def bn_apply_pallas(y, scale, shift, *, tile):
    n_pad, hpad = y.shape
    return pl.pallas_call(
        _bn_apply_kernel,
        out_shape=jax.ShapeDtypeStruct((n_pad, hpad), jnp.float32),
        grid=(n_pad // tile,),
        in_specs=[
            pl.BlockSpec((tile, hpad), lambda i: (i, 0)),
            pl.BlockSpec((1, hpad), lambda i: (0, 0)),
            pl.BlockSpec((1, hpad), lambda i: (0, 0)),
        ],
        out_specs=pl.BlockSpec((tile, hpad), lambda i: (i, 0)),
        compiler_params=pltpu.CompilerParams(
            dimension_semantics=("parallel",)),
    )(y, scale, shift)


def pool_pallas(b_pad, z_slab, *, tile):
    g_pad, n_pad = b_pad.shape
    f = z_slab.shape[1]
    return pl.pallas_call(
        _pool_kernel,
        out_shape=jax.ShapeDtypeStruct((g_pad, f), jnp.float32),
        grid=(n_pad // tile,),
        in_specs=[
            pl.BlockSpec((g_pad, tile), lambda k: (0, k)),
            pl.BlockSpec((tile, f), lambda k: (k, 0)),
        ],
        out_specs=pl.BlockSpec((g_pad, f), lambda k: (0, 0)),
        scratch_shapes=[pltpu.VMEM((g_pad, f), jnp.float32)],
        compiler_params=pltpu.CompilerParams(
            dimension_semantics=("arbitrary",)),
    )(b_pad, z_slab)


# ----------------------------------------------------------------------------
# Glue: normalized adjacency, params, forward
# ----------------------------------------------------------------------------

def build_norm_adj(edge_index, num_nodes):
    """gcn_norm with add_self_loops=True: A_hat = D^-1/2 (A + I) D^-1/2."""
    src = edge_index[0]
    dst = edge_index[1]
    loop = jnp.arange(num_nodes, dtype=src.dtype)
    src = jnp.concatenate([src, loop])
    dst = jnp.concatenate([dst, loop])
    deg = jnp.zeros((num_nodes,), jnp.float32).at[dst].add(1.0)
    dinv = jnp.where(deg > 0, 1.0 / jnp.sqrt(deg), 0.0)
    vals = dinv[src] * dinv[dst]
    a_hat = jnp.zeros((num_nodes, num_nodes), jnp.float32).at[dst, src].add(vals)
    return a_hat


def init_params(key, input_dim, hidden_dim, num_layers):
    hpad = _round_up(hidden_dim, 128)
    params = []
    din = input_dim
    for i in range(num_layers):
        dout = hidden_dim
        key, k1, k2, k3 = jax.random.split(key, 4)
        bound = 1.0 / math.sqrt(din)
        w = jax.random.uniform(k1, (dout, din), jnp.float32, -bound, bound)
        b_lin = jax.random.uniform(k2, (dout,), jnp.float32, -bound, bound)
        b_gcn = jax.random.uniform(k3, (dout,), jnp.float32, -bound, bound)
        gamma = jnp.ones((dout,), jnp.float32)   # BatchNorm1d default weight
        beta = jnp.zeros((dout,), jnp.float32)   # BatchNorm1d default bias

        din_pad = din if i == 0 else hpad        # later layers read the padded slab
        w_pad = jnp.zeros((din_pad, hpad), jnp.float32).at[:din, :dout].set(w.T)

        def pad_vec(v):
            return jnp.zeros((1, hpad), jnp.float32).at[0, :dout].set(v)

        params.append(dict(
            w=w, b_lin=b_lin, b_gcn=b_gcn, gamma=gamma, beta=beta,
            w_pad=w_pad, b_lin_pad=pad_vec(b_lin), b_gcn_pad=pad_vec(b_gcn),
            gamma_pad=pad_vec(gamma), beta_pad=pad_vec(beta)))
        din = hidden_dim
    return params


@functools.partial(jax.jit, static_argnames=("hidden_dim", "num_graphs", "tile"))
def gcnv_forward(x, edge_index, batch, params, *, hidden_dim, num_graphs, tile=128):
    n = x.shape[0]
    num_layers = len(params)
    hpad = _round_up(hidden_dim, 128)
    n_pad = _round_up(max(n, tile), tile)
    g_pad = _round_up(max(num_graphs, 8), 8)
    n_extra = n_pad - n

    # Dense normalized adjacency, zero-padded then cast to bf16 (halves HBM bytes
    # of the dominant O(N^2) traffic; accumulation stays f32 on the MXU).
    a_hat = build_norm_adj(edge_index, n)
    a_pad = jnp.zeros((n_pad, n_pad), jnp.float32).at[:n, :n].set(a_hat)
    a_bf16 = a_pad.astype(jnp.bfloat16)

    pool_mat = jax.nn.one_hot(batch, num_graphs, dtype=jnp.float32).T  # [G, N]
    b_pad = jnp.zeros((g_pad, n_pad), jnp.float32).at[:num_graphs, :n].set(pool_mat)

    x_pad = jnp.zeros((n_pad, x.shape[1]), jnp.float32).at[:n, :].set(x)

    z = x_pad
    zs_pad = []
    for p in params:
        # Prologue: H = X @ W^T + b_lin  (hoisted out of the A_hat sweep)
        h = linear_pallas(z, p["w_pad"], p["b_lin_pad"], tile=tile)
        # Tiled A_hat @ H + relu, with per-row-tile BN partial sums.
        y, stats = propagate_pallas(a_bf16, h, p["b_gcn_pad"], tile=tile)

        # BN finish (two-pass over all N real nodes).  Padded rows of A_hat are
        # exactly zero, so each padded row of y equals relu(b_gcn) exactly —
        # subtract their contribution from the column statistics.
        y_pad_row = jnp.maximum(p["b_gcn_pad"][0], 0.0)
        col_sum = stats[:, 0, :].sum(axis=0) - n_extra * y_pad_row
        col_sq = stats[:, 1, :].sum(axis=0) - n_extra * y_pad_row * y_pad_row
        mean = col_sum / n
        var = jnp.maximum(col_sq / n - mean * mean, 0.0)   # biased var (training BN)
        inv_std = jax.lax.rsqrt(var + 1e-5)
        scale = (p["gamma_pad"][0] * inv_std)[None, :]
        shift = (p["beta_pad"][0] - mean * p["gamma_pad"][0] * inv_std)[None, :]

        z = bn_apply_pallas(y, scale, shift, tile=tile)    # lane-dense [n_pad, hpad]
        zs_pad.append(z)

    # global_add_pool over the lane-dense padded slab (padded node columns of B
    # are zero, padded hidden columns are exactly zero), then slice.
    z_slab = jnp.concatenate(zs_pad, axis=1)               # [n_pad, L*hpad]
    g_slab = pool_pallas(b_pad, z_slab, tile=tile)         # [g_pad, L*hpad]

    z_out = jnp.concatenate([zp[:n, :hidden_dim] for zp in zs_pad], axis=1)
    g_out = jnp.concatenate(
        [g_slab[:num_graphs, l * hpad:l * hpad + hidden_dim]
         for l in range(num_layers)], axis=1)
    return z_out, g_out


# ----------------------------------------------------------------------------
# Pure-JAX reference (mirrors the PyTorch forward) for a correctness check
# ----------------------------------------------------------------------------

def gcnv_reference(x, edge_index, batch, params, hidden_dim, num_graphs):
    n = x.shape[0]
    a_hat = build_norm_adj(edge_index, n)
    pool = jax.nn.one_hot(batch, num_graphs, dtype=jnp.float32).T
    z = x
    zs = []
    for p in params:
        h = z @ p["w"].T + p["b_lin"]
        z = a_hat @ h + p["b_gcn"]
        z = jnp.maximum(z, 0.0)
        mean = z.mean(axis=0, keepdims=True)
        var = ((z - mean) ** 2).mean(axis=0, keepdims=True)
        z = (z - mean) * jax.lax.rsqrt(var + 1e-5) * p["gamma"] + p["beta"]
        zs.append(z)
    z_cat = jnp.concatenate(zs, axis=1)
    g_cat = jnp.concatenate([pool @ zz for zz in zs], axis=1)
    return z_cat, g_cat


if __name__ == "__main__":
    input_dim = 16
    hidden_dim = 32
    num_layers = 2
    num_nodes = 250          # not a tile multiple: exercises the padding path
    num_graphs = 4
    num_edges = 1024
    tile = 128               # 512 also fits the VMEM budget on v5e/v6e/v7x

    key = jax.random.PRNGKey(0)
    k_x, k_src, k_dst, k_params = jax.random.split(key, 4)

    x = jax.random.normal(k_x, (num_nodes, input_dim), jnp.float32)
    src = jax.random.randint(k_src, (num_edges,), 0, num_nodes, jnp.int32)
    dst = jax.random.randint(k_dst, (num_edges,), 0, num_nodes, jnp.int32)
    edge_index = jnp.stack([src, dst], axis=0)                      # [2, E]
    batch = ((jnp.arange(num_nodes) * num_graphs) // num_nodes).astype(jnp.int32)

    params = init_params(k_params, input_dim, hidden_dim, num_layers)

    z_out, g_out = gcnv_forward(x, edge_index, batch, params,
                                hidden_dim=hidden_dim,
                                num_graphs=num_graphs, tile=tile)
    jax.block_until_ready((z_out, g_out))

    assert z_out.shape == (num_nodes, hidden_dim * num_layers)
    assert g_out.shape == (num_graphs, hidden_dim * num_layers)

    # Loose tolerance: A_hat/H are bf16 on the MXU (f32 accumulation).
    z_ref, g_ref = gcnv_reference(x, edge_index, batch, params,
                                  hidden_dim, num_graphs)
    assert bool(jnp.allclose(z_out, z_ref, atol=0.15, rtol=0.05))
    assert bool(jnp.allclose(g_out, g_ref, atol=1.0, rtol=0.05))

    print("KERNEL_OK")
</pallas_src>

<mosaic_0001>
module attributes {stable_mosaic.version = 11 : i64} {
  func.func @_linear_kernel(%arg0: i32, %arg1: memref<128x16xf32, #tpu.memory_space<vmem>>, %arg2: memref<16x128xf32, #tpu.memory_space<vmem>>, %arg3: memref<1x128xf32, #tpu.memory_space<vmem>>, %arg4: memref<128x128xbf16, #tpu.memory_space<vmem>>) attributes {dimension_semantics = [#tpu.dimension_semantics<parallel>], iteration_bounds = array<i64: 2>, scalar_prefetch = 0 : i64, scratch_operands = 0 : i64, tpu.core_type = #tpu.core_type<tc>, window_params = [{transform_indices = @transform_0, window_bounds = array<i64: 128, 16>}, {pipeline_mode = #tpu.pipeline_mode<synchronous>, transform_indices = @transform_1, window_bounds = array<i64: 16, 128>}, {pipeline_mode = #tpu.pipeline_mode<synchronous>, transform_indices = @transform_2, window_bounds = array<i64: 1, 128>}, {transform_indices = @transform_3, window_bounds = array<i64: 128, 128>}]} {
    %c0 = arith.constant 0 : index
    %c0_0 = arith.constant 0 : index
    %0 = vector.load %arg1[%c0, %c0_0] : memref<128x16xf32, #tpu.memory_space<vmem>>, vector<128x16xf32>
    %c0_1 = arith.constant 0 : index
    %c0_2 = arith.constant 0 : index
    %1 = vector.load %arg2[%c0_1, %c0_2] : memref<16x128xf32, #tpu.memory_space<vmem>>, vector<16x128xf32>
    %cst = arith.constant dense<0.000000e+00> : vector<128x128xf32>
    %2 = tpu.matmul %0, %1, %cst {dimension_numbers = #tpu.dot_dimension_numbers<[1], [0], [0], [1], [0, 0, 1, 1], [], []>} : vector<128x16xf32>, vector<16x128xf32>, vector<128x128xf32> -> vector<128x128xf32>
    %c0_3 = arith.constant 0 : index
    %c0_4 = arith.constant 0 : index
    %3 = vector.load %arg3[%c0_3, %c0_4] : memref<1x128xf32, #tpu.memory_space<vmem>>, vector<1x128xf32>
    %4 = vector.broadcast %3 : vector<1x128xf32> to vector<128x128xf32>
    %5 = arith.addf %2, %4 : vector<128x128xf32>
    %6 = arith.truncf %5 : vector<128x128xf32> to vector<128x128xbf16>
    %c0_5 = arith.constant 0 : index
    %c0_6 = arith.constant 0 : index
    %7 = vector.load %arg4[%c0_5, %c0_6] : memref<128x128xbf16, #tpu.memory_space<vmem>>, vector<128x128xbf16>
    tpu.vector_store %arg4[%c0_5, %c0_6], %6 {strides = array<i32>} : memref<128x128xbf16, #tpu.memory_space<vmem>>, vector<128x128xbf16>,
    return
  }
  func.func @transform_0(%arg0: i32) -> (i32, i32) {
    %c0_i32 = arith.constant 0 : i32
    %c0_i32_0 = arith.constant 0 : i32
    return %arg0, %c0_i32 : i32, i32
  }
  func.func @transform_1(%arg0: i32) -> (i32, i32) {
    %c0_i32 = arith.constant 0 : i32
    %c0_i32_0 = arith.constant 0 : i32
    %c0_i32_1 = arith.constant 0 : i32
    return %c0_i32, %c0_i32_0 : i32, i32
  }
  func.func @transform_2(%arg0: i32) -> (i32, i32) {
    %c0_i32 = arith.constant 0 : i32
    %c0_i32_0 = arith.constant 0 : i32
    %c0_i32_1 = arith.constant 0 : i32
    return %c0_i32, %c0_i32_0 : i32, i32
  }
  func.func @transform_3(%arg0: i32) -> (i32, i32) {
    %c0_i32 = arith.constant 0 : i32
    %c0_i32_0 = arith.constant 0 : i32
    return %arg0, %c0_i32 : i32, i32
  }
}

module attributes {stable_mosaic.version = 11 : i64} {
  func.func @_propagate_kernel(%arg0: i32, %arg1: i32, %arg2: memref<128x128xbf16, #tpu.memory_space<vmem>>, %arg3: memref<128x128xbf16, #tpu.memory_space<vmem>>, %arg4: memref<1x128xf32, #tpu.memory_space<vmem>>, %arg5: memref<128x128xf32, #tpu.memory_space<vmem>>, %arg6: memref<1x8x128xf32, #tpu.memory_space<vmem>>, %arg7: memref<128x128xf32, #tpu.memory_space<vmem>>) attributes {dimension_semantics = [#tpu.dimension_semantics<parallel>, #tpu.dimension_semantics<arbitrary>], iteration_bounds = array<i64: 2, 2>, scalar_prefetch = 0 : i64, scratch_operands = 1 : i64, tpu.core_type = #tpu.core_type<tc>, window_params = [{transform_indices = @transform_0, window_bounds = array<i64: 128, 128>}, {transform_indices = @transform_1, window_bounds = array<i64: 128, 128>}, {pipeline_mode = #tpu.pipeline_mode<synchronous>, transform_indices = @transform_2, window_bounds = array<i64: 1, 128>}, {transform_indices = @transform_3, window_bounds = array<i64: 128, 128>}, {transform_indices = @transform_4, window_bounds = array<i64: 1, 8, 128>}]} {
    %c0_i32 = arith.constant 0 : i32
    %0 = arith.cmpi eq, %arg1, %c0_i32 : i32
    %1 = arith.extui %0 : i1 to i32
    %c0_i32_0 = arith.constant 0 : i32
    %2 = arith.cmpi ne, %1, %c0_i32_0 : i32
    scf.if %2 {
      %cst_9 = arith.constant 0.000000e+00 : f32
      %12 = vector.broadcast %cst_9 : f32 to vector<128x128xf32>
      %c0_10 = arith.constant 0 : index
      %c0_11 = arith.constant 0 : index
      %13 = vector.load %arg7[%c0_10, %c0_11] : memref<128x128xf32, #tpu.memory_space<vmem>>, vector<128x128xf32>
      tpu.vector_store %arg7[%c0_10, %c0_11], %12 {strides = array<i32>} : memref<128x128xf32, #tpu.memory_space<vmem>>, vector<128x128xf32>,
    } else {
    }
    %c0 = arith.constant 0 : index
    %c0_1 = arith.constant 0 : index
    %3 = vector.load %arg7[%c0, %c0_1] : memref<128x128xf32, #tpu.memory_space<vmem>>, vector<128x128xf32>
    %c0_2 = arith.constant 0 : index
    %c0_3 = arith.constant 0 : index
    %4 = vector.load %arg2[%c0_2, %c0_3] : memref<128x128xbf16, #tpu.memory_space<vmem>>, vector<128x128xbf16>
    %c0_4 = arith.constant 0 : index
    %c0_5 = arith.constant 0 : index
    %5 = vector.load %arg3[%c0_4, %c0_5] : memref<128x128xbf16, #tpu.memory_space<vmem>>, vector<128x128xbf16>
    %cst = arith.constant dense<0.000000e+00> : vector<128x128xf32>
    %6 = tpu.matmul %4, %5, %cst {dimension_numbers = #tpu.dot_dimension_numbers<[1], [0], [0], [1], [0, 0, 1, 1], [], []>} : vector<128x128xbf16>, vector<128x128xbf16>, vector<128x128xf32> -> vector<128x128xf32>
    %7 = arith.addf %3, %6 : vector<128x128xf32>
    %c0_6 = arith.constant 0 : index
    %c0_7 = arith.constant 0 : index
    %8 = vector.load %arg7[%c0_6, %c0_7] : memref<128x128xf32, #tpu.memory_space<vmem>>, vector<128x128xf32>
    tpu.vector_store %arg7[%c0_6, %c0_7], %7 {strides = array<i32>} : memref<128x128xf32, #tpu.memory_space<vmem>>, vector<128x128xf32>,
    %c1_i32 = arith.constant 1 : i32
    %9 = arith.cmpi eq, %arg1, %c1_i32 : i32
    %10 = arith.extui %9 : i1 to i32
    %c0_i32_8 = arith.constant 0 : i32
    %11 = arith.cmpi ne, %10, %c0_i32_8 : i32
    scf.if %11 {
      %c0_9 = arith.constant 0 : index
      %c0_10 = arith.constant 0 : index
      %12 = vector.load %arg7[%c0_9, %c0_10] : memref<128x128xf32, #tpu.memory_space<vmem>>, vector<128x128xf32>
      %c0_11 = arith.constant 0 : index
      %c0_12 = arith.constant 0 : index
      %13 = vector.load %arg4[%c0_11, %c0_12] : memref<1x128xf32, #tpu.memory_space<vmem>>, vector<1x128xf32>
      %14 = vector.broadcast %13 : vector<1x128xf32> to vector<128x128xf32>
      %15 = arith.addf %12, %14 : vector<128x128xf32>
      %cst_13 = arith.constant 0.000000e+00 : f32
      %16 = vector.broadcast %cst_13 : f32 to vector<128x128xf32>
      %17 = arith.maximumf %15, %16 : vector<128x128xf32>
      %c0_14 = arith.constant 0 : index
      %c0_15 = arith.constant 0 : index
      %18 = vector.load %arg5[%c0_14, %c0_15] : memref<128x128xf32, #tpu.memory_space<vmem>>, vector<128x128xf32>
      tpu.vector_store %arg5[%c0_14, %c0_15], %17 {strides = array<i32>} : memref<128x128xf32, #tpu.memory_space<vmem>>, vector<128x128xf32>,
      %cst_16 = arith.constant dense<0.000000e+00> : vector<128xf32>
      %19 = vector.multi_reduction <add>, %17, %cst_16 [0] : vector<128x128xf32> to vector<128xf32>
      %20 = vector.shape_cast %19 : vector<128xf32> to vector<1x128xf32>
      %21 = arith.mulf %17, %17 : vector<128x128xf32>
      %cst_17 = arith.constant dense<0.000000e+00> : vector<128xf32>
      %22 = vector.multi_reduction <add>, %21, %cst_17 [0] : vector<128x128xf32> to vector<128xf32>
      %23 = vector.shape_cast %22 : vector<128xf32> to vector<1x128xf32>
      %cst_18 = arith.constant 0.000000e+00 : f32
      %24 = vector.broadcast %cst_18 : f32 to vector<6x128xf32>
      %25 = tpu.concatenate %20, %23, %24 in 0 : vector<1x128xf32>, vector<1x128xf32>, vector<6x128xf32> -> vector<8x128xf32>
      %c0_19 = arith.constant 0 : index
      %c0_20 = arith.constant 0 : index
      %c0_21 = arith.constant 0 : index
      %26 = vector.load %arg6[%c0_19, %c0_20, %c0_21] : memref<1x8x128xf32, #tpu.memory_space<vmem>>, vector<1x8x128xf32>
      %27 = vector.shape_cast %26 : vector<1x8x128xf32> to vector<8x128xf32>
      %28 = vector.shape_cast %25 : vector<8x128xf32> to vector<1x8x128xf32>
      tpu.vector_store %arg6[%c0_19, %c0_20, %c0_21], %28 {strides = array<i32>} : memref<1x8x128xf32, #tpu.memory_space<vmem>>, vector<1x8x128xf32>,
    } else {
    }
    return
  }
  func.func @transform_0(%arg0: i32, %arg1: i32) -> (i32, i32) {
    %c0_i32 = arith.constant 0 : i32
    return %arg0, %arg1 : i32, i32
  }
  func.func @transform_1(%arg0: i32, %arg1: i32) -> (i32, i32) {
    %c0_i32 = arith.constant 0 : i32
    %c0_i32_0 = arith.constant 0 : i32
    return %arg1, %c0_i32 : i32, i32
  }
  func.func @transform_2(%arg0: i32, %arg1: i32) -> (i32, i32) {
    %c0_i32 = arith.constant 0 : i32
    %c0_i32_0 = arith.constant 0 : i32
    %c0_i32_1 = arith.constant 0 : i32
    return %c0_i32, %c0_i32_0 : i32, i32
  }
  func.func @transform_3(%arg0: i32, %arg1: i32) -> (i32, i32) {
    %c0_i32 = arith.constant 0 : i32
    %c0_i32_0 = arith.constant 0 : i32
    return %arg0, %c0_i32 : i32, i32
  }
  func.func @transform_4(%arg0: i32, %arg1: i32) -> (i32, i32, i32) {
    %c0_i32 = arith.constant 0 : i32
    %c0_i32_0 = arith.constant 0 : i32
    %c0_i32_1 = arith.constant 0 : i32
    return %arg0, %c0_i32, %c0_i32_0 : i32, i32, i32
  }
}

module attributes {stable_mosaic.version = 11 : i64} {
  func.func @_bn_apply_kernel(%arg0: i32, %arg1: memref<128x128xf32, #tpu.memory_space<vmem>>, %arg2: memref<1x128xf32, #tpu.memory_space<vmem>>, %arg3: memref<1x128xf32, #tpu.memory_space<vmem>>, %arg4: memref<128x128xf32, #tpu.memory_space<vmem>>) attributes {dimension_semantics = [#tpu.dimension_semantics<parallel>], iteration_bounds = array<i64: 2>, scalar_prefetch = 0 : i64, scratch_operands = 0 : i64, tpu.core_type = #tpu.core_type<tc>, window_params = [{transform_indices = @transform_0, window_bounds = array<i64: 128, 128>}, {pipeline_mode = #tpu.pipeline_mode<synchronous>, transform_indices = @transform_1, window_bounds = array<i64: 1, 128>}, {pipeline_mode = #tpu.pipeline_mode<synchronous>, transform_indices = @transform_2, window_bounds = array<i64: 1, 128>}, {transform_indices = @transform_3, window_bounds = array<i64: 128, 128>}]} {
    %c0 = arith.constant 0 : index
    %c0_0 = arith.constant 0 : index
    %0 = vector.load %arg1[%c0, %c0_0] : memref<128x128xf32, #tpu.memory_space<vmem>>, vector<128x128xf32>
    %c0_1 = arith.constant 0 : index
    %c0_2 = arith.constant 0 : index
    %1 = vector.load %arg2[%c0_1, %c0_2] : memref<1x128xf32, #tpu.memory_space<vmem>>, vector<1x128xf32>
    %2 = vector.broadcast %1 : vector<1x128xf32> to vector<128x128xf32>
    %3 = arith.mulf %0, %2 : vector<128x128xf32>
    %c0_3 = arith.constant 0 : index
    %c0_4 = arith.constant 0 : index
    %4 = vector.load %arg3[%c0_3, %c0_4] : memref<1x128xf32, #tpu.memory_space<vmem>>, vector<1x128xf32>
    %5 = vector.broadcast %4 : vector<1x128xf32> to vector<128x128xf32>
    %6 = arith.addf %3, %5 : vector<128x128xf32>
    %c0_5 = arith.constant 0 : index
    %c0_6 = arith.constant 0 : index
    %7 = vector.load %arg4[%c0_5, %c0_6] : memref<128x128xf32, #tpu.memory_space<vmem>>, vector<128x128xf32>
    tpu.vector_store %arg4[%c0_5, %c0_6], %6 {strides = array<i32>} : memref<128x128xf32, #tpu.memory_space<vmem>>, vector<128x128xf32>,
    return
  }
  func.func @transform_0(%arg0: i32) -> (i32, i32) {
    %c0_i32 = arith.constant 0 : i32
    %c0_i32_0 = arith.constant 0 : i32
    return %arg0, %c0_i32 : i32, i32
  }
  func.func @transform_1(%arg0: i32) -> (i32, i32) {
    %c0_i32 = arith.constant 0 : i32
    %c0_i32_0 = arith.constant 0 : i32
    %c0_i32_1 = arith.constant 0 : i32
    return %c0_i32, %c0_i32_0 : i32, i32
  }
  func.func @transform_2(%arg0: i32) -> (i32, i32) {
    %c0_i32 = arith.constant 0 : i32
    %c0_i32_0 = arith.constant 0 : i32
    %c0_i32_1 = arith.constant 0 : i32
    return %c0_i32, %c0_i32_0 : i32, i32
  }
  func.func @transform_3(%arg0: i32) -> (i32, i32) {
    %c0_i32 = arith.constant 0 : i32
    %c0_i32_0 = arith.constant 0 : i32
    return %arg0, %c0_i32 : i32, i32
  }
}

module attributes {stable_mosaic.version = 11 : i64} {
  func.func @_linear_kernel(%arg0: i32, %arg1: memref<128x128xf32, #tpu.memory_space<vmem>>, %arg2: memref<128x128xf32, #tpu.memory_space<vmem>>, %arg3: memref<1x128xf32, #tpu.memory_space<vmem>>, %arg4: memref<128x128xbf16, #tpu.memory_space<vmem>>) attributes {dimension_semantics = [#tpu.dimension_semantics<parallel>], iteration_bounds = array<i64: 2>, scalar_prefetch = 0 : i64, scratch_operands = 0 : i64, tpu.core_type = #tpu.core_type<tc>, window_params = [{transform_indices = @transform_0, window_bounds = array<i64: 128, 128>}, {pipeline_mode = #tpu.pipeline_mode<synchronous>, transform_indices = @transform_1, window_bounds = array<i64: 128, 128>}, {pipeline_mode = #tpu.pipeline_mode<synchronous>, transform_indices = @transform_2, window_bounds = array<i64: 1, 128>}, {transform_indices = @transform_3, window_bounds = array<i64: 128, 128>}]} {
    %c0 = arith.constant 0 : index
    %c0_0 = arith.constant 0 : index
    %0 = vector.load %arg1[%c0, %c0_0] : memref<128x128xf32, #tpu.memory_space<vmem>>, vector<128x128xf32>
    %c0_1 = arith.constant 0 : index
    %c0_2 = arith.constant 0 : index
    %1 = vector.load %arg2[%c0_1, %c0_2] : memref<128x128xf32, #tpu.memory_space<vmem>>, vector<128x128xf32>
    %cst = arith.constant dense<0.000000e+00> : vector<128x128xf32>
    %2 = tpu.matmul %0, %1, %cst {dimension_numbers = #tpu.dot_dimension_numbers<[1], [0], [0], [1], [0, 0, 1, 1], [], []>} : vector<128x128xf32>, vector<128x128xf32>, vector<128x128xf32> -> vector<128x128xf32>
    %c0_3 = arith.constant 0 : index
    %c0_4 = arith.constant 0 : index
    %3 = vector.load %arg3[%c0_3, %c0_4] : memref<1x128xf32, #tpu.memory_space<vmem>>, vector<1x128xf32>
    %4 = vector.broadcast %3 : vector<1x128xf32> to vector<128x128xf32>
    %5 = arith.addf %2, %4 : vector<128x128xf32>
    %6 = arith.truncf %5 : vector<128x128xf32> to vector<128x128xbf16>
    %c0_5 = arith.constant 0 : index
    %c0_6 = arith.constant 0 : index
    %7 = vector.load %arg4[%c0_5, %c0_6] : memref<128x128xbf16, #tpu.memory_space<vmem>>, vector<128x128xbf16>
    tpu.vector_store %arg4[%c0_5, %c0_6], %6 {strides = array<i32>} : memref<128x128xbf16, #tpu.memory_space<vmem>>, vector<128x128xbf16>,
    return
  }
  func.func @transform_0(%arg0: i32) -> (i32, i32) {
    %c0_i32 = arith.constant 0 : i32
    %c0_i32_0 = arith.constant 0 : i32
    return %arg0, %c0_i32 : i32, i32
  }
  func.func @transform_1(%arg0: i32) -> (i32, i32) {
    %c0_i32 = arith.constant 0 : i32
    %c0_i32_0 = arith.constant 0 : i32
    %c0_i32_1 = arith.constant 0 : i32
    return %c0_i32, %c0_i32_0 : i32, i32
  }
  func.func @transform_2(%arg0: i32) -> (i32, i32) {
    %c0_i32 = arith.constant 0 : i32
    %c0_i32_0 = arith.constant 0 : i32
    %c0_i32_1 = arith.constant 0 : i32
    return %c0_i32, %c0_i32_0 : i32, i32
  }
  func.func @transform_3(%arg0: i32) -> (i32, i32) {
    %c0_i32 = arith.constant 0 : i32
    %c0_i32_0 = arith.constant 0 : i32
    return %arg0, %c0_i32 : i32, i32
  }
}

module attributes {stable_mosaic.version = 11 : i64} {
  func.func @_pool_kernel(%arg0: i32, %arg1: memref<8x128xf32, #tpu.memory_space<vmem>>, %arg2: memref<128x256xf32, #tpu.memory_space<vmem>>, %arg3: memref<8x256xf32, #tpu.memory_space<vmem>>, %arg4: memref<8x256xf32, #tpu.memory_space<vmem>>) attributes {dimension_semantics = [#tpu.dimension_semantics<arbitrary>], iteration_bounds = array<i64: 2>, scalar_prefetch = 0 : i64, scratch_operands = 1 : i64, tpu.core_type = #tpu.core_type<tc>, window_params = [{transform_indices = @transform_0, window_bounds = array<i64: 8, 128>}, {transform_indices = @transform_1, window_bounds = array<i64: 128, 256>}, {pipeline_mode = #tpu.pipeline_mode<synchronous>, transform_indices = @transform_2, window_bounds = array<i64: 8, 256>}]} {
    %c0_i32 = arith.constant 0 : i32
    %0 = arith.cmpi eq, %arg0, %c0_i32 : i32
    %1 = arith.extui %0 : i1 to i32
    %c0_i32_0 = arith.constant 0 : i32
    %2 = arith.cmpi ne, %1, %c0_i32_0 : i32
    scf.if %2 {
      %cst_9 = arith.constant 0.000000e+00 : f32
      %12 = vector.broadcast %cst_9 : f32 to vector<8x256xf32>
      %c0_10 = arith.constant 0 : index
      %c0_11 = arith.constant 0 : index
      %13 = vector.load %arg4[%c0_10, %c0_11] : memref<8x256xf32, #tpu.memory_space<vmem>>, vector<8x256xf32>
      tpu.vector_store %arg4[%c0_10, %c0_11], %12 {strides = array<i32>} : memref<8x256xf32, #tpu.memory_space<vmem>>, vector<8x256xf32>,
    } else {
    }
    %c0 = arith.constant 0 : index
    %c0_1 = arith.constant 0 : index
    %3 = vector.load %arg4[%c0, %c0_1] : memref<8x256xf32, #tpu.memory_space<vmem>>, vector<8x256xf32>
    %c0_2 = arith.constant 0 : index
    %c0_3 = arith.constant 0 : index
    %4 = vector.load %arg1[%c0_2, %c0_3] : memref<8x128xf32, #tpu.memory_space<vmem>>, vector<8x128xf32>
    %c0_4 = arith.constant 0 : index
    %c0_5 = arith.constant 0 : index
    %5 = vector.load %arg2[%c0_4, %c0_5] : memref<128x256xf32, #tpu.memory_space<vmem>>, vector<128x256xf32>
    %cst = arith.constant dense<0.000000e+00> : vector<8x256xf32>
    %6 = tpu.matmul %4, %5, %cst {dimension_numbers = #tpu.dot_dimension_numbers<[1], [0], [0], [1], [0, 0, 1, 1], [], []>} : vector<8x128xf32>, vector<128x256xf32>, vector<8x256xf32> -> vector<8x256xf32>
    %7 = arith.addf %3, %6 : vector<8x256xf32>
    %c0_6 = arith.constant 0 : index
    %c0_7 = arith.constant 0 : index
    %8 = vector.load %arg4[%c0_6, %c0_7] : memref<8x256xf32, #tpu.memory_space<vmem>>, vector<8x256xf32>
    tpu.vector_store %arg4[%c0_6, %c0_7], %7 {strides = array<i32>} : memref<8x256xf32, #tpu.memory_space<vmem>>, vector<8x256xf32>,
    %c1_i32 = arith.constant 1 : i32
    %9 = arith.cmpi eq, %arg0, %c1_i32 : i32
    %10 = arith.extui %9 : i1 to i32
    %c0_i32_8 = arith.constant 0 : i32
    %11 = arith.cmpi ne, %10, %c0_i32_8 : i32
    scf.if %11 {
      %c0_9 = arith.constant 0 : index
      %c0_10 = arith.constant 0 : index
      %12 = vector.load %arg4[%c0_9, %c0_10] : memref<8x256xf32, #tpu.memory_space<vmem>>, vector<8x256xf32>
      %c0_11 = arith.constant 0 : index
      %c0_12 = arith.constant 0 : index
      %13 = vector.load %arg3[%c0_11, %c0_12] : memref<8x256xf32, #tpu.memory_space<vmem>>, vector<8x256xf32>
      tpu.vector_store %arg3[%c0_11, %c0_12], %12 {strides = array<i32>} : memref<8x256xf32, #tpu.memory_space<vmem>>, vector<8x256xf32>,
    } else {
    }
    return
  }
  func.func @transform_0(%arg0: i32) -> (i32, i32) {
    %c0_i32 = arith.constant 0 : i32
    %c0_i32_0 = arith.constant 0 : i32
    return %c0_i32, %arg0 : i32, i32
  }
  func.func @transform_1(%arg0: i32) -> (i32, i32) {
    %c0_i32 = arith.constant 0 : i32
    %c0_i32_0 = arith.constant 0 : i32
    return %arg0, %c0_i32 : i32, i32
  }
  func.func @transform_2(%arg0: i32) -> (i32, i32) {
    %c0_i32 = arith.constant 0 : i32
    %c0_i32_0 = arith.constant 0 : i32
    %c0_i32_1 = arith.constant 0 : i32
    return %c0_i32, %c0_i32_0 : i32, i32
  }
}

</mosaic_0001>

<bundles_post_ra>
// kernel: mul.15
= control target key start
LH: loop header
LB: loop body
LE: loop exit
PB: predicated region body
PF: predicated region fallthrough
CT: control target
= control target key end

     0   :  { %s56_s0 = inlined_call_operand.vmem [shape: f32[1274], index: 0, kind: input, shape index: {}]   ;;  %s57_s1 = inlined_call_operand.vmem [shape: f32[1274], index: 1, kind: input, shape index: {}]   ;;  %s58_s2 = inlined_call_operand.vmem [shape: f32[1274], index: 2, kind: output, shape index: {}]  }
   0x1   :  { %v3_v0 = vld [vmem:[%s56_s0] sm:$0xff]  ;;  %v20_v2 = vld [vmem:[%s56_s0 + $0x8] sm:$0xff] }
   0x2   :  { %v4_v1 = vld [vmem:[%s57_s1] sm:$0xff]  ;;  %v21_v4 = vld [vmem:[%s57_s1 + $0x8] sm:$0xff] }
   0x3   :  { %v7_v3 = vmul.f32 %v4_v1, %v3_v0  ;;  %v16_v5 = vmul.f32 %v21_v4, %v20_v2 }
   0x5   :  { %9 = vst [vmem:[%s58_s2] sm:$0xff] %v7_v3  ;;  %22 = vst [vmem:[%s58_s2 + $0x8] sm:$0xff] %v16_v5 }

// kernel: gcnv_forward.7
= control target key start
LH: loop header
LB: loop body
LE: loop exit
PB: predicated region body
PF: predicated region fallthrough
CT: control target
= control target key end

     0   :  { %s724_s12 = smov 0   ;;  %s780_s0 = inlined_call_operand.vmem [shape: f32[256,16], index: 0, kind: input, shape index: {}]   ;;  %s781_s1 = inlined_call_operand.vmem [shape: f32[16,128], index: 1, kind: input, shape index: {}]   ;;  %s782_s2 = inlined_call_operand.vmem [shape: f32[1,128], index: 2, kind: input, shape index: {}]   ;;  %s783_s3 = inlined_call_operand.vmem [shape: bf16[256,128], index: 3, kind: output, shape index: {}]  }
   0x1 LB: > { %s529_s13 = sadd.s32 4294967295, %s702_s12   ;;  %p533_p0 = scmp.ge.s32.totalorder %s702_s12, 1  ;;  %s702_s12 = sphi %s724_s12, %s13_s12  }
   0x2   : > { %p138_p1 = scmp.lt.s32.totalorder %s702_s12, 3 }
   0x4   : > { %p139_p2 = pnand %p533_p0, %p138_p1 }
   0x5   : > { %v190_v0 = vld [vmem:[%s781_s1] sm:$0xff] (!%p139_p2)  ;;  %v191_v1 = vld [vmem:[%s781_s1 + $0x8] sm:$0xff] (!%p139_p2)  ;;  %s534_s18 = sshll.u32 (!%p139_p2), %s529_s13, 4  ;;  %vm199_vm0 = vcmask (!%p139_p2), 130048  }
   0x6   : > { %142 = sbr.rel (%p139_p2) target bundleno = 249 (0xf9), region = 32  ;;  %v682_v2 = vpack.c.bf16 (!%p139_p2), %v191_v1, %v190_v0  ;;  %p163_p3 = scmp.lt.s32.totalorder (!%p139_p2), %s534_s18, 31  ;;  %v538_v19 = vld [vmem:[%s782_s2] ss:$0 sm:$0xff] (!%p139_p2) }
   0x8   : > { %683 = vmatprep.subr.bf16.mxu0 (!%p139_p2), %v682_v2  ;;  %686 = vmatprep.subr.bf16.mxu1 (!%p139_p2), %v682_v2 }
   0x9   : > { %685 = vmatpush3.bf16.msra.mxu0 (!%p139_p2), %v682_v2  ;;  %687 = vmatpush3.bf16.msra.mxu1 (!%p139_p2), %v682_v2 }
   0xd   : > { %s785_s18 = smov (!%p163_p3, %s534_s18), 31 }
   0xe   : > { %s535_s19 = sshll.u32 %s785_s18, 3  ;;  %s537_s25 = sshll.u32 %s785_s18, 2 }
   0xf   : > { %s166_s22 = scalar_lea.vmem %s780_s0, %s535_s19  ;;  %s767_s28 = scalar_lea.vmem %s783_s3, %s537_s25 }
  0x10   : > { %v174_v3 = vld [vmem:[%s166_s22] sm:$0xff]  ;;  %v175_v5 = vld [vmem:[%s166_s22 + $0x8] sm:$0xff]  ;;  %v176_v7 = vld [vmem:[%s166_s22 + $0x10] sm:$0xff] }
  0x11   : > { %v182_v4 = vld [vmem:[%s166_s22 + $0x40] sm:$0xff]  ;;  %658 = vmatprep.mubr.msk.f32.mxu0 %vm199_vm0, %v174_v3  ;;  %v183_v6 = vld [vmem:[%s166_s22 + $0x48] sm:$0xff]  ;;  %v184_v8 = vld [vmem:[%s166_s22 + $0x50] sm:$0xff] }
  0x12   : > { %670 = vmatprep.mubr.msk.f32.mxu1 %vm199_vm0, %v182_v4  ;;  %659 = vmatmul.mubr.msk.f32.vlgmr.msra.gmra.mrb[0].mxu0 %vm199_vm0, %v175_v5  ;;  %v177_v9 = vld [vmem:[%s166_s22 + $0x18] sm:$0xff]  ;;  %v178_v11 = vld [vmem:[%s166_s22 + $0x20] sm:$0xff]  ;;  %v179_v13 = vld [vmem:[%s166_s22 + $0x28] sm:$0xff] }
  0x13   : > { %671 = vmatmul.mubr.msk.f32.vlgmr.msra.gmra.mrb[0].mxu1 %vm199_vm0, %v183_v6  ;;  %661 = vmatprep.mubr.msk.f32.mxu0 %vm199_vm0, %v176_v7  ;;  %v185_v10 = vld [vmem:[%s166_s22 + $0x58] sm:$0xff]  ;;  %v186_v12 = vld [vmem:[%s166_s22 + $0x60] sm:$0xff]  ;;  %v187_v14 = vld [vmem:[%s166_s22 + $0x68] sm:$0xff] }
  0x14   : > { %673 = vmatprep.mubr.msk.f32.mxu1 %vm199_vm0, %v184_v8  ;;  %v180_v15 = vld [vmem:[%s166_s22 + $0x30] sm:$0xff]  ;;  %v181_v17 = vld [vmem:[%s166_s22 + $0x38] sm:$0xff] }
  0x15   : > { %v188_v16 = vld [vmem:[%s166_s22 + $0x70] sm:$0xff]  ;;  %v189_v18 = vld [vmem:[%s166_s22 + $0x78] sm:$0xff] }
  0x16   : > { %662 = vmatmul.mubr.msk.f32.gmra.mrb[2].mxu0 %vm199_vm0, %v177_v9 }
  0x17   : > { %674 = vmatmul.mubr.msk.f32.gmra.mrb[2].mxu1 %vm199_vm0, %v185_v10  ;;  %664 = vmatprep.mubr.msk.f32.mxu0 %vm199_vm0, %v178_v11 }
  0x18   : > { %676 = vmatprep.mubr.msk.f32.mxu1 %vm199_vm0, %v186_v12 }
  0x1a   : > { %665 = vmatmul.mubr.msk.f32.gmra.mrb[4].mxu0 %vm199_vm0, %v179_v13 }
  0x1b   : > { %677 = vmatmul.mubr.msk.f32.gmra.mrb[4].mxu1 %vm199_vm0, %v187_v14  ;;  %667 = vmatprep.mubr.msk.f32.mxu0 %vm199_vm0, %v180_v15 }
  0x1c   : > { %679 = vmatprep.mubr.msk.f32.mxu1 %vm199_vm0, %v188_v16 }
  0x1e   : > { %668 = vmatmul.mubr.msk.f32.gmra.mrb[6].mxu0 %vm199_vm0, %v181_v17 }
  0x1f   : > { %680 = vmatmul.mubr.msk.f32.gmra.mrb[6].mxu1 %vm199_vm0, %v189_v18 }
  0xe5   : > { %v660_v20 = vpop.f32.mrb[0].mxu0 }
  0xe6   : > { %v672_v21 = vpop.f32.mrb[0].mxu1  ;;  %v320_v22 = vadd.f32 %v660_v20, %v538_v19  ;;  %v314_v24 = vpop.f32.mrb[1].mxu0 }
  0xe7   : > { %v360_v23 = vadd.f32 %v672_v21, %v538_v19  ;;  %v354_v25 = vpop.f32.mrb[1].mxu1  ;;  %v315_v26 = vadd.f32 %v538_v19, %v314_v24 }
  0xe8   : > { %v355_v27 = vadd.f32 %v538_v19, %v354_v25 }
  0xe9   : > { %v592_v28 = vpack.c.bf16 %v320_v22, %v315_v26  ;;  %v663_v30 = vpop.f32.mrb[2].mxu0 }
  0xea   : > { %v612_v29 = vpack.c.bf16 %v360_v23, %v355_v27  ;;  %v675_v31 = vpop.f32.mrb[2].mxu1  ;;  %v330_v32 = vadd.f32 %v663_v30, %v538_v19  ;;  %v324_v34 = vpop.f32.mrb[3].mxu0 }
  0xeb   : > { %v370_v33 = vadd.f32 %v675_v31, %v538_v19  ;;  %v364_v35 = vpop.f32.mrb[3].mxu1  ;;  %593 = vst [vmem:[%s767_s28] sm:$0xff] %v592_v28   ;;  %v325_v36 = vadd.f32 %v538_v19, %v324_v34 }
  0xec   : > { %632 = vst [vmem:[%s767_s28 + $0x20] sm:$0xff] %v612_v29   ;;  %v365_v37 = vadd.f32 %v538_v19, %v364_v35 }
  0xed   : > { %v597_v38 = vpack.c.bf16 %v330_v32, %v325_v36  ;;  %v666_v40 = vpop.f32.mrb[4].mxu0 }
  0xee   : > { %v617_v39 = vpack.c.bf16 %v370_v33, %v365_v37  ;;  %v678_v41 = vpop.f32.mrb[4].mxu1  ;;  %v340_v42 = vadd.f32 %v666_v40, %v538_v19  ;;  %v334_v44 = vpop.f32.mrb[5].mxu0 }
  0xef   : > { %v380_v43 = vadd.f32 %v678_v41, %v538_v19  ;;  %v374_v45 = vpop.f32.mrb[5].mxu1  ;;  %629 = vst [vmem:[%s767_s28 + $0x8] sm:$0xff] %v597_v38   ;;  %v335_v46 = vadd.f32 %v538_v19, %v334_v44 }
  0xf0   : > { %633 = vst [vmem:[%s767_s28 + $0x28] sm:$0xff] %v617_v39   ;;  %v375_v47 = vadd.f32 %v538_v19, %v374_v45 }
  0xf1   : > { %v602_v48 = vpack.c.bf16 %v340_v42, %v335_v46  ;;  %v669_v50 = vpop.f32.mrb[6].mxu0 }
  0xf2   : > { %v622_v49 = vpack.c.bf16 %v380_v43, %v375_v47  ;;  %v681_v51 = vpop.f32.mrb[6].mxu1  ;;  %v350_v52 = vadd.f32 %v669_v50, %v538_v19  ;;  %v344_v54 = vpop.f32.mrb[7].mxu0 }
  0xf3   : > { %v390_v53 = vadd.f32 %v681_v51, %v538_v19  ;;  %v384_v55 = vpop.f32.mrb[7].mxu1  ;;  %630 = vst [vmem:[%s767_s28 + $0x10] sm:$0xff] %v602_v48   ;;  %v345_v56 = vadd.f32 %v538_v19, %v344_v54 }
  0xf4   : > { %634 = vst [vmem:[%s767_s28 + $0x30] sm:$0xff] %v622_v49   ;;  %v385_v57 = vadd.f32 %v538_v19, %v384_v55 }
  0xf5   : > { %v607_v58 = vpack.c.bf16 %v350_v52, %v345_v56 }
  0xf6   : > { %v627_v59 = vpack.c.bf16 %v390_v53, %v385_v57 }
  0xf7   : > { %631 = vst [vmem:[%s767_s28 + $0x18] sm:$0xff] %v607_v58  }
  0xf8   : > { %635 = vst [vmem:[%s767_s28 + $0x38] sm:$0xff] %v627_v59  }
  0xf9 PF: > { %s13_s12 = sadd.s32 1, %s702_s12  }
  0xfa   : > { %p10_p4 = scmp.ge.s32.totalorder %s13_s12, 4  }
  0xfc   :  { %12 = sbr.rel (!%p10_p4) target bundleno = 1 (0x1), region = 62 }

// kernel: mul.3
= control target key start
LH: loop header
LB: loop body
LE: loop exit
PB: predicated region body
PF: predicated region fallthrough
CT: control target
= control target key end

     0   :  { %s34_s0 = inlined_call_operand.vmem [shape: f32[1,128], index: 0, kind: input, shape index: {}]   ;;  %s35_s1 = inlined_call_operand.vmem [shape: f32[1,128], index: 1, kind: input, shape index: {}]   ;;  %s36_s2 = inlined_call_operand.vmem [shape: f32[1,128], index: 2, kind: output, shape index: {}]  }
   0x1   :  { %v3_v0 = vld [vmem:[%s34_s0] sm:$0x1] }
   0x2   :  { %v4_v1 = vld [vmem:[%s35_s1] sm:$0x1] }
   0x3   :  { %v7_v2 = vmul.f32 %v4_v1, %v3_v0 }
   0x5   :  { %9 = vst [vmem:[%s36_s2] sm:$0x1] %v7_v2 }

// kernel: gcnv_forward.8
= control target key start
LH: loop header
LB: loop body
LE: loop exit
PB: predicated region body
PF: predicated region fallthrough
CT: control target
= control target key end

     0   :  { %s1158_s15 = smov 0   ;;  %s1160_s16 = smov 0   ;;  %s1337_s0 = inlined_call_operand.vmem [shape: bf16[256,256], index: 0, kind: input, shape index: {}]   ;;  %s1338_s1 = inlined_call_operand.vmem [shape: bf16[256,128], index: 1, kind: input, shape index: {}]   ;;  %s1339_s2 = inlined_call_operand.vmem [shape: f32[1,128], index: 2, kind: input, shape index: {}]   ;;  %s1340_s3 = inlined_call_operand.vmem [shape: f32[256,128], index: 3, kind: output, shape index: {0}]   ;;  %s1341_s4 = inlined_call_operand.vmem [shape: f32[2,8,128], index: 4, kind: output, shape index: {1}]  }
   0x1   :  { %s1162_s17 = smov 0   ;;  %s1164_s18 = smov 0  }
   0x2   :  { %s1166_s19 = smov 0   ;;  %s1168_s20 = smov 0  }
   0x3   :  { %s1170_s21 = smov 0  }
   0x4 LB: > { %s24_s22 = sadd.s32 1, %s1122_s19  ;;  %s27_s23 = sadd.s32 1, %s1126_s20  ;;  %s1130_s21 = sphi %s1170_s21, %s15_s21   ;;  %s1126_s20 = sphi %s1168_s20, %s1347_s20   ;;  %s1122_s19 = sphi %s1166_s19, %s1346_s19   ;;  %s1118_s18 = sphi %s1164_s18, %s1345_s18   ;;  %s1114_s17 = sphi %s1162_s17, %s1344_s17   ;;  %s1110_s16 = sphi %s1160_s16, %s1343_s16   ;;  %s1106_s15 = sphi %s1158_s15, %s1342_s15  }
   0x5   : > { %p25_p0 = scmp.ge.s32.totalorder %s24_s22, 2  ;;  %p43_p1 = scmp.ne.s32.totalorder %s1110_s16, %s1106_s15 }
   0x6   : > { %p44_p2 = scmp.eq.s32.totalorder %s1130_s21, 0  ;;  %s36_s27 = sadd.s32 1, %s1110_s16 }
   0x7   : > { %s1349_s22 = smov (%p25_p0, %s24_s22), 0  ;;  %s1351_s23 = smov (!%p25_p0, %s27_s23), %s1126_s20 }
   0x8   : > { %p45_p3 = por %p44_p2, %p43_p1  ;;  %p29_p4 = scmp.ge.s32.totalorder %s1351_s23, 2 }
   0x9   : > { %s32_s24 = ssub.s32 %s1122_s19, %s1349_s22  ;;  %p905_p6 = scmp.ge.s32.totalorder %s1130_s21, 4 }
   0xa   : > { %s1353_s23 = smov (%p29_p4, %s1351_s23), 0 }
   0xb   : > { %s31_s25 = ssub.s32 %s1126_s20, %s1353_s23  ;;  %171 = sbr.rel (%p905_p6) target bundleno = 34 (0x22), region = 20 }
   0xc   : > { %s33_s26 = sor.u32 %s32_s24, %s31_s25 }
   0xd   : > { %p34_p5 = scmp.eq.s32.totalorder %s33_s26, 0 }
   0xf   : > { %s1209_s28 = scalar_select %p34_p5, %s1110_s16, %s36_s27  }
  0x12   : > { %174 = sbr.rel (!%p45_p3) target bundleno = 34 (0x22), region = 24  ;;  %s176_s29 = sand.u32 (%p45_p3), 1, %s1110_s16  }
  0x13   : > { %s938_s30 = sshll.u32 (%p45_p3), %s1126_s20, 5  ;;  %s906_s5 = sshll.u32 (%p45_p3), %s176_s29, 6 }
  0x14   : > { %s181_s6 = sadd.s32 (%p45_p3), %s1122_s19, %s938_s30  ;;  %s178_s11 = scalar_lea.vmem (%p45_p3), [#allocation3], %s906_s5 }
  0x15   : > { %s909_s7 = sshll.u32 (%p45_p3), %s181_s6, 2 }
  0x16   : > { %s1218_s10 = scalar_lea.vmem (%p45_p3), %s1337_s0, %s909_s7 }
  0x17   : > { %v199_v0 = vld [vmem:[%s1218_s10] sm:$0xf] (%p45_p3)  ;;  %v201_v1 = vld [vmem:[%s1218_s10 + $0x8] sm:$0xf] (%p45_p3)  ;;  %v203_v2 = vld [vmem:[%s1218_s10 + $0x10] sm:$0xf] (%p45_p3) }
  0x18   : > { %200 = vst [vmem:[%s178_s11] sm:$0xf] (%p45_p3), %v199_v0  ;;  %202 = vst [vmem:[%s178_s11 + $0x4] sm:$0xf] (%p45_p3), %v201_v1  ;;  %v205_v3 = vld [vmem:[%s1218_s10 + $0x18] sm:$0xf] (%p45_p3) }
  0x19   : > { %204 = vst [vmem:[%s178_s11 + $0x8] sm:$0xf] %v203_v2  ;;  %v207_v4 = vld [vmem:[%s1218_s10 + $0x20] sm:$0xf]  ;;  %v209_v5 = vld [vmem:[%s1218_s10 + $0x28] sm:$0xf] }
  0x1a   : > { %206 = vst [vmem:[%s178_s11 + $0xc] sm:$0xf] %v205_v3  ;;  %208 = vst [vmem:[%s178_s11 + $0x10] sm:$0xf] %v207_v4  ;;  %v211_v6 = vld [vmem:[%s1218_s10 + $0x30] sm:$0xf] }
  0x1b   : > { %210 = vst [vmem:[%s178_s11 + $0x14] sm:$0xf] %v209_v5  ;;  %v213_v7 = vld [vmem:[%s1218_s10 + $0x38] sm:$0xf]  ;;  %v215_v8 = vld [vmem:[%s1218_s10 + $0x40] sm:$0xf] }
  0x1c   : > { %212 = vst [vmem:[%s178_s11 + $0x18] sm:$0xf] %v211_v6  ;;  %214 = vst [vmem:[%s178_s11 + $0x1c] sm:$0xf] %v213_v7  ;;  %v217_v9 = vld [vmem:[%s1218_s10 + $0x48] sm:$0xf] }
  0x1d   : > { %216 = vst [vmem:[%s178_s11 + $0x20] sm:$0xf] %v215_v8  ;;  %v219_v10 = vld [vmem:[%s1218_s10 + $0x50] sm:$0xf]  ;;  %v221_v11 = vld [vmem:[%s1218_s10 + $0x58] sm:$0xf] }
  0x1e   : > { %218 = vst [vmem:[%s178_s11 + $0x24] sm:$0xf] %v217_v9  ;;  %220 = vst [vmem:[%s178_s11 + $0x28] sm:$0xf] %v219_v10  ;;  %v223_v12 = vld [vmem:[%s1218_s10 + $0x60] sm:$0xf] }
  0x1f   : > { %222 = vst [vmem:[%s178_s11 + $0x2c] sm:$0xf] %v221_v11  ;;  %v225_v13 = vld [vmem:[%s1218_s10 + $0x68] sm:$0xf]  ;;  %v227_v14 = vld [vmem:[%s1218_s10 + $0x70] sm:$0xf] }
  0x20   : > { %224 = vst [vmem:[%s178_s11 + $0x30] sm:$0xf] %v223_v12  ;;  %226 = vst [vmem:[%s178_s11 + $0x34] sm:$0xf] %v225_v13  ;;  %v229_v15 = vld [vmem:[%s1218_s10 + $0x78] sm:$0xf] }
  0x21   : > { %228 = vst [vmem:[%s178_s11 + $0x38] sm:$0xf] %v227_v14  ;;  %230 = vst [vmem:[%s178_s11 + $0x3c] sm:$0xf] %v229_v15 }
  0x22 PF: > { %p910_p7 = scmp.ge.s32.totalorder %s1130_s21, 1  ;;  %p293_p8 = scmp.lt.s32.totalorder %s1130_s21, 5 }
  0x24   : > { %p294_p9 = pnand %p910_p7, %p293_p8 }
  0x25   : > { %s300_s12 = sand.u32 (!%p294_p9), 1, %s1106_s15   ;;  %s912_s13 = sshll.u32 (!%p294_p9), %s1114_s17, 4 }
  0x26   : > { %297 = sbr.rel (%p294_p9) target bundleno = 365 (0x16d), region = 69  ;;  %s911_s14 = sshll.u32 (!%p294_p9), %s300_s12, 6 }
  0x27   : > { %p336_p10 = scmp.lt.s32.totalorder (!%p294_p9), %s912_s13, 31  ;;  %s914_s24 = sshll.u32 (!%p294_p9), %s1118_s18, 4 }
  0x28   : > { %p342_p11 = scmp.lt.s32.totalorder (!%p294_p9), %s914_s24, 31  ;;  %p347_p12 = scmp.lt.s32.totalorder (!%p294_p9), %s1118_s18, 1 }
  0x29   : > { %s1258_s11 = scalar_lea.vmem (!%p294_p9), [#allocation3], %s911_s14  ;;  %p917_p13 = scmp.ne.s32.totalorder (!%p294_p9), %s1114_s17, 0 }
  0x2d   : > { %s1355_s13 = smov (!%p336_p10, %s912_s13), 31  ;;  %s1357_s24 = smov (!%p342_p11, %s914_s24), 31 }
  0x2e   : > { %s913_s25 = sshll.u32 %s1355_s13, 2  ;;  %s1359_s18 = smov (!%p347_p12, %s1118_s18), 1  ;;  %v1132_v16 = vmov (!%p917_p13), 0.0  }
  0x2f   : > { %s1245_s29 = scalar_lea.vmem %s1338_s1, %s913_s25  ;;  %s915_s30 = sshll.u32 %s1357_s24, 3  ;;  %356 = vst [vmem:[#allocation2] sm:$0xff] (!%p917_p13), %v1132_v16  ;;  %357 = vst [vmem:[#allocation2 + $0x8] sm:$0xff] (!%p917_p13), %v1132_v16 }
  0x30   : > { %s1251_s15 = scalar_lea.vmem %s1340_s3, %s915_s30  ;;  %s916_s7 = sshll.u32 %s1359_s18, 3  ;;  %358 = vst [vmem:[#allocation2 + $0x10] sm:$0xff] (!%p917_p13), %v1132_v16  ;;  %359 = vst [vmem:[#allocation2 + $0x18] sm:$0xff] (!%p917_p13), %v1132_v16 }
  0x31   : > { %s1256_s10 = scalar_lea.vmem %s1341_s4, %s916_s7  ;;  %355 = sbr.rel (%p917_p13) target bundleno = 56 (0x38), region = 77  ;;  %360 = vst [vmem:[#allocation2 + $0x20] sm:$0xff] (!%p917_p13), %v1132_v16  ;;  %361 = vst [vmem:[#allocation2 + $0x28] sm:$0xff] (!%p917_p13), %v1132_v16 }
  0x32   : > { %362 = vst [vmem:[#allocation2 + $0x30] sm:$0xff] (!%p917_p13), %v1132_v16  ;;  %363 = vst [vmem:[#allocation2 + $0x38] sm:$0xff] (!%p917_p13), %v1132_v16 }
  0x33   : > { %364 = vst [vmem:[#allocation2 + $0x40] sm:$0xff] (!%p917_p13), %v1132_v16  ;;  %365 = vst [vmem:[#allocation2 + $0x48] sm:$0xff] (!%p917_p13), %v1132_v16 }
  0x34   : > { %366 = vst [vmem:[#allocation2 + $0x50] sm:$0xff] (!%p917_p13), %v1132_v16  ;;  %367 = vst [vmem:[#allocation2 + $0x58] sm:$0xff] (!%p917_p13), %v1132_v16 }
  0x35   : > { %368 = vst [vmem:[#allocation2 + $0x60] sm:$0xff] (!%p917_p13), %v1132_v16  ;;  %369 = vst [vmem:[#allocation2 + $0x68] sm:$0xff] (!%p917_p13), %v1132_v16 }
  0x36   : > { %370 = vst [vmem:[#allocation2 + $0x70] sm:$0xff] (!%p917_p13), %v1132_v16  ;;  %371 = vst [vmem:[#allocation2 + $0x78] sm:$0xff] (!%p917_p13), %v1132_v16 }
  0x38 PF: > { %v1060_v17 = vld [vmem:[%s1245_s29] sm:$0xff]   ;;  %v1061_v18 = vld [vmem:[%s1245_s29 + $0x8] sm:$0xff]   ;;  %v1062_v19 = vld [vmem:[%s1245_s29 + $0x10] sm:$0xff]   ;;  %p934_p0 = scmp.ne.s32.totalorder %s1114_s17, 1 }
  0x39   : > { %955 = vmatprep.subr.bf16.mxu0 %v1060_v17  ;;  %987 = vmatprep.subr.bf16.mxu1 %v1060_v17  ;;  %v1063_v20 = vld [vmem:[%s1245_s29 + $0x18] sm:$0xff]   ;;  %v1068_v21 = vld [vmem:[%s1258_s11] sm:$0xff]   ;;  %v1065_v24 = vld [vmem:[%s1245_s29 + $0x28] sm:$0xff]   ;;  %vm778_vm0 = vcmask (!%p934_p0), 1040384   ;;  %vm780_vm1 = vcmask (!%p934_p0), 1041408  }
  0x3a   : > { %956 = vmatpush3.bf16.msra.mxu0 %v1060_v17  ;;  %995 = vmatpush3.bf16.msra.mxu1 %v1060_v17  ;;  %v1069_v22 = vld [vmem:[%s1258_s11 + $0x20] sm:$0xff]   ;;  %v1066_v25 = vld [vmem:[%s1245_s29 + $0x30] sm:$0xff]   ;;  %v1067_v26 = vld [vmem:[%s1245_s29 + $0x38] sm:$0xff]  }
  0x3b   : > { %957 = vmatprep.subr.bf16.mxu0 %v1061_v18  ;;  %988 = vmatprep.subr.bf16.mxu1 %v1061_v18  ;;  %v1064_v23 = vld [vmem:[%s1245_s29 + $0x20] sm:$0xff]   ;;  %v1070_v27 = vld [vmem:[%s1258_s11 + $0x8] sm:$0xff]   ;;  %v1072_v29 = vld [vmem:[%s1258_s11 + $0x10] sm:$0xff]  }
  0x3c   : > { %971 = vmatprep.mubr.bf16.mxu0 %v1068_v21  ;;  %979 = vmatprep.mubr.bf16.mxu1 %v1069_v22  ;;  %v1071_v28 = vld [vmem:[%s1258_s11 + $0x28] sm:$0xff]   ;;  %v1073_v30 = vld [vmem:[%s1258_s11 + $0x30] sm:$0xff]   ;;  %v1074_v31 = vld [vmem:[%s1258_s11 + $0x18] sm:$0xff]  }
  0x3d   : > { %v1075_v32 = vld [vmem:[%s1258_s11 + $0x38] sm:$0xff]   ;;  %v374_v33 = vld [vmem:[#allocation2 + $0x10] sm:$0xff]  ;;  %v372_v35 = vld [vmem:[#allocation2] sm:$0xff] }
  0x3e   : > { %958 = vmatpush3.bf16.msra.mxu0 %v1061_v18  ;;  %996 = vmatpush3.bf16.msra.mxu1 %v1061_v18  ;;  %v382_v34 = vld [vmem:[#allocation2 + $0x50] sm:$0xff]  ;;  %v380_v36 = vld [vmem:[#allocation2 + $0x40] sm:$0xff]  ;;  %v375_v39 = vld [vmem:[#allocation2 + $0x18] sm:$0xff] }
  0x3f   : > { %959 = vmatprep.subr.bf16.mxu0 %v1062_v19  ;;  %989 = vmatprep.subr.bf16.mxu1 %v1062_v19  ;;  %v383_v40 = vld [vmem:[#allocation2 + $0x58] sm:$0xff]  ;;  %v373_v45 = vld [vmem:[#allocation2 + $0x8] sm:$0xff]  ;;  %v378_v57 = vld [vmem:[#allocation2 + $0x30] sm:$0xff] }
  0x40   : > { %v381_v46 = vld [vmem:[#allocation2 + $0x48] sm:$0xff]  ;;  %v386_v58 = vld [vmem:[#allocation2 + $0x70] sm:$0xff]  ;;  %v376_v59 = vld [vmem:[#allocation2 + $0x20] sm:$0xff] }
  0x41   : > { %v384_v60 = vld [vmem:[#allocation2 + $0x60] sm:$0xff]  ;;  %v379_v63 = vld [vmem:[#allocation2 + $0x38] sm:$0xff]  ;;  %v377_v5 = vld [vmem:[#allocation2 + $0x28] sm:$0xff] }
  0x42   : > { %960 = vmatpush3.bf16.msra.mxu0 %v1062_v19  ;;  %997 = vmatpush3.bf16.msra.mxu1 %v1062_v19  ;;  %v387_v0 = vld [vmem:[#allocation2 + $0x78] sm:$0xff]  ;;  %v385_v6 = vld [vmem:[#allocation2 + $0x68] sm:$0xff]  ;;  %v1281_v18 = vld [vmem:[%s1339_s2] ss:$0 sm:$0xff] (!%p934_p0) }
  0x43   : > { %961 = vmatprep.subr.bf16.mxu0 %v1063_v20  ;;  %990 = vmatprep.subr.bf16.mxu1 %v1063_v20 }
  0x46   : > { %962 = vmatpush3.bf16.msra.mxu0 %v1063_v20  ;;  %998 = vmatpush3.bf16.msra.mxu1 %v1063_v20 }
  0x47   : > { %963 = vmatprep.subr.bf16.mxu0 %v1064_v23  ;;  %991 = vmatprep.subr.bf16.mxu1 %v1064_v23 }
  0x4a   : > { %964 = vmatpush3.bf16.msra.mxu0 %v1064_v23  ;;  %999 = vmatpush3.bf16.msra.mxu1 %v1064_v23 }
  0x4b   : > { %965 = vmatprep.subr.bf16.mxu0 %v1065_v24  ;;  %992 = vmatprep.subr.bf16.mxu1 %v1065_v24 }
  0x4e   : > { %966 = vmatpush3.bf16.msra.mxu0 %v1065_v24  ;;  %1000 = vmatpush3.bf16.msra.mxu1 %v1065_v24 }
  0x4f   : > { %967 = vmatprep.subr.bf16.mxu0 %v1066_v25  ;;  %993 = vmatprep.subr.bf16.mxu1 %v1066_v25 }
  0x52   : > { %968 = vmatpush3.bf16.msra.mxu0 %v1066_v25  ;;  %1001 = vmatpush3.bf16.msra.mxu1 %v1066_v25 }
  0x53   : > { %969 = vmatprep.subr.bf16.mxu0 %v1067_v26  ;;  %994 = vmatprep.subr.bf16.mxu1 %v1067_v26 }
  0x56   : > { %970 = vmatpush3.bf16.msra.mxu0 %v1067_v26  ;;  %1002 = vmatpush3.bf16.msra.mxu1 %v1067_v26 }
  0x59   : > { %972 = vmatmul.mubr.bf16.vlgmr.msra.gmra.mrb[0].mxu0 %v1070_v27  ;;  %980 = vmatmul.mubr.bf16.vlgmr.msra.gmra.mrb[0].mxu1 %v1071_v28 }
  0x5a   : > { %975 = vmatprep.mubr.bf16.mxu0 %v1072_v29  ;;  %983 = vmatprep.mubr.bf16.mxu1 %v1073_v30 }
  0x61   : > { %976 = vmatmul.mubr.bf16.gmra.mrb[4].mxu0 %v1074_v31  ;;  %984 = vmatmul.mubr.bf16.gmra.mrb[4].mxu1 %v1075_v32 }
 0x12c   : > { %v973_v37 = vpop.f32.mrb[0].mxu0  ;;  %v981_v38 = vpop.f32.mrb[0].mxu1 }
 0x12d   : > { %v615_v41 = vadd.f32 %v973_v37, %v374_v33  ;;  %v623_v42 = vadd.f32 %v981_v38, %v382_v34  ;;  %v550_v43 = vpop.f32.mrb[1].mxu0  ;;  %v582_v44 = vpop.f32.mrb[1].mxu1 }
 0x12e   : > { %v613_v47 = vadd.f32 %v550_v43, %v372_v35  ;;  %v621_v48 = vadd.f32 %v582_v44, %v380_v36  ;;  %v974_v49 = vpop.f32.mrb[2].mxu0  ;;  %v982_v50 = vpop.f32.mrb[2].mxu1 }
 0x12f   : > { %631 = vst [vmem:[#allocation2 + $0x10] sm:$0xff] %v615_v41  ;;  %639 = vst [vmem:[#allocation2 + $0x50] sm:$0xff] %v623_v42  ;;  %v616_v51 = vadd.f32 %v974_v49, %v375_v39  ;;  %v624_v52 = vadd.f32 %v982_v50, %v383_v40  ;;  %v553_v53 = vpop.f32.mrb[3].mxu0  ;;  %v585_v54 = vpop.f32.mrb[3].mxu1 }
 0x130   : > { %629 = vst [vmem:[#allocation2] sm:$0xff] %v613_v47  ;;  %637 = vst [vmem:[#allocation2 + $0x40] sm:$0xff] %v621_v48  ;;  %v614_v55 = vadd.f32 %v553_v53, %v373_v45  ;;  %v622_v56 = vadd.f32 %v585_v54, %v381_v46 }
 0x131   : > { %632 = vst [vmem:[#allocation2 + $0x18] sm:$0xff] %v616_v51  ;;  %640 = vst [vmem:[#allocation2 + $0x58] sm:$0xff] %v624_v52 }
 0x132   : > { %630 = vst [vmem:[#allocation2 + $0x8] sm:$0xff] %v614_v55  ;;  %638 = vst [vmem:[#allocation2 + $0x48] sm:$0xff] %v622_v56 }
 0x134   : > { %v977_v61 = vpop.f32.mrb[4].mxu0  ;;  %v985_v62 = vpop.f32.mrb[4].mxu1  ;;  %648 = sbr.rel (%p934_p0) target bundleno = 365 (0x16d), region = 81 }
 0x135   : > { %v619_v1 = vadd.f32 %v977_v61, %v378_v57  ;;  %v627_v2 = vadd.f32 %v985_v62, %v386_v58  ;;  %v566_v3 = vpop.f32.mrb[5].mxu0  ;;  %v598_v4 = vpop.f32.mrb[5].mxu1 }
 0x136   : > { %v617_v7 = vadd.f32 %v566_v3, %v376_v59  ;;  %v625_v8 = vadd.f32 %v598_v4, %v384_v60  ;;  %v978_v9 = vpop.f32.mrb[6].mxu0  ;;  %v986_v10 = vpop.f32.mrb[6].mxu1  ;;  %v651_v22 = vld [vmem:[#allocation2 + $0x10] sm:$0xff] (!%p934_p0) }
 0x137   : > { %635 = vst [vmem:[#allocation2 + $0x30] sm:$0xff] %v619_v1  ;;  %643 = vst [vmem:[#allocation2 + $0x70] sm:$0xff] %v627_v2  ;;  %v620_v11 = vadd.f32 %v978_v9, %v379_v63  ;;  %v628_v12 = vadd.f32 %v986_v10, %v387_v0  ;;  %v569_v13 = vpop.f32.mrb[7].mxu0  ;;  %v601_v14 = vpop.f32.mrb[7].mxu1  ;;  %v649_v17 = vld [vmem:[#allocation2] sm:$0xff] (!%p934_p0)  ;;  %v674_v25 = vadd.f32 (!%p934_p0), %v1281_v18, %v651_v22  ;;  %v659_v45 = vld [vmem:[#allocation2 + $0x50] sm:$0xff] (!%p934_p0) }
 0x138   : > { %633 = vst [vmem:[#allocation2 + $0x20] sm:$0xff] %v617_v7  ;;  %641 = vst [vmem:[#allocation2 + $0x60] sm:$0xff] %v625_v8  ;;  %v618_v15 = vadd.f32 %v569_v13, %v377_v5  ;;  %v626_v16 = vadd.f32 %v601_v14, %v385_v6  ;;  %v672_v20 = vadd.f32 (!%p934_p0), %v1281_v18, %v649_v17  ;;  %v652_v23 = vld [vmem:[#allocation2 + $0x18] sm:$0xff] (!%p934_p0)  ;;  %v657_v43 = vld [vmem:[#allocation2 + $0x40] sm:$0xff] (!%p934_p0) }
 0x139   : > { %636 = vst [vmem:[#allocation2 + $0x38] sm:$0xff] %v620_v11  ;;  %644 = vst [vmem:[#allocation2 + $0x78] sm:$0xff] %v628_v12  ;;  %v650_v19 = vld [vmem:[#allocation2 + $0x8] sm:$0xff] (!%p934_p0)  ;;  %v675_v26 = vadd.f32 (!%p934_p0), %v1281_v18, %v652_v23  ;;  %v690_v35 = vmax.f32 (!%p934_p0), %v674_v25, 0.0  ;;  %v660_v48 = vld [vmem:[#allocation2 + $0x58] sm:$0xff] (!%p934_p0)  ;;  %v680_v55 = vadd.f32 (!%p934_p0), %v1281_v18, %v657_v43  ;;  %v682_v57 = vadd.f32 (!%p934_p0), %v1281_v18, %v659_v45 }
 0x13a   : > { %634 = vst [vmem:[#allocation2 + $0x28] sm:$0xff] %v618_v15  ;;  %642 = vst [vmem:[#allocation2 + $0x68] sm:$0xff] %v626_v16  ;;  %v673_v21 = vadd.f32 (!%p934_p0), %v1281_v18, %v650_v19  ;;  %v688_v31 = vmax.f32 (!%p934_p0), %v672_v20, 0.0  ;;  %v658_v44 = vld [vmem:[#allocation2 + $0x48] sm:$0xff] (!%p934_p0)  ;;  %v683_v62 = vadd.f32 (!%p934_p0), %v1281_v18, %v660_v48 }
 0x13b   : > { %v691_v36 = vmax.f32 %v675_v26, 0.0  ;;  %706 = vst [vmem:[%s1251_s15 + $0x10] sm:$0xff] %v690_v35  ;;  %v743_v46 = vmul.f32 %v690_v35, %v690_v35  ;;  %v681_v56 = vadd.f32 %v1281_v18, %v658_v44  ;;  %v696_v63 = vmax.f32 %v680_v55, 0.0 }
 0x13c   : > { %v689_v32 = vmax.f32 %v673_v21, 0.0  ;;  %704 = vst [vmem:[%s1251_s15] sm:$0xff] %v688_v31  ;;  %v741_v39 = vmul.f32 %v688_v31, %v688_v31  ;;  %v698_v1 = vmax.f32 %v682_v57, 0.0  ;;  %v699_v5 = vmax.f32 %v683_v62, 0.0 }
 0x13d   : > { %707 = vst [vmem:[%s1251_s15 + $0x18] sm:$0xff] %v691_v36  ;;  %v744_v51 = vmul.f32 %v691_v36, %v691_v36  ;;  %v697_v0 = vmax.f32 %v681_v56, 0.0  ;;  %712 = vst [vmem:[%s1251_s15 + $0x40] sm:$0xff] %v696_v63 }
 0x13e   : > { %v655_v29 = vld [vmem:[#allocation2 + $0x30] sm:$0xff]  ;;  %705 = vst [vmem:[%s1251_s15 + $0x8] sm:$0xff] %v689_v32  ;;  %v720_v40 = vadd.f32 %v689_v32, %v688_v31  ;;  %v742_v41 = vmul.f32 %v689_v32, %v689_v32  ;;  %714 = vst [vmem:[%s1251_s15 + $0x50] sm:$0xff] %v698_v1 }
 0x13f   : > { %v653_v24 = vld [vmem:[#allocation2 + $0x20] sm:$0xff]  ;;  %v678_v34 = vadd.f32 %v1281_v18, %v655_v29  ;;  %v663_v7 = vld [vmem:[#allocation2 + $0x70] sm:$0xff]  ;;  %713 = vst [vmem:[%s1251_s15 + $0x48] sm:$0xff] %v697_v0  ;;  %715 = vst [vmem:[%s1251_s15 + $0x58] sm:$0xff] %v699_v5 }
 0x140   : > { %v676_v27 = vadd.f32 %v1281_v18, %v653_v24  ;;  %v656_v30 = vld [vmem:[#allocation2 + $0x38] sm:$0xff]  ;;  %v757_v49 = vadd.f32 %v742_v41, %v741_v39  ;;  %v721_v50 = vadd.f32 %v720_v40, %v690_v35  ;;  %v661_v53 = vld [vmem:[#allocation2 + $0x60] sm:$0xff]  ;;  %v686_v14 = vadd.f32 %v1281_v18, %v663_v7 }
 0x141   : > { %v654_v28 = vld [vmem:[#allocation2 + $0x28] sm:$0xff]  ;;  %v679_v38 = vadd.f32 %v1281_v18, %v656_v30  ;;  %v694_v47 = vmax.f32 %v678_v34, 0.0  ;;  %v684_v2 = vadd.f32 %v1281_v18, %v661_v53  ;;  %v664_v8 = vld [vmem:[#allocation2 + $0x78] sm:$0xff]  ;;  %v749_v24 = vmul.f32 %v696_v63, %v696_v63 }
 0x142   : > { %v677_v33 = vadd.f32 %v1281_v18, %v654_v28  ;;  %v692_v37 = vmax.f32 %v676_v27, 0.0  ;;  %v662_v58 = vld [vmem:[#allocation2 + $0x68] sm:$0xff]  ;;  %v758_v59 = vadd.f32 %v757_v49, %v743_v46  ;;  %v722_v60 = vadd.f32 %v721_v50, %v691_v36 }
 0x143   : > { %v695_v52 = vmax.f32 %v679_v38, 0.0  ;;  %710 = vst [vmem:[%s1251_s15 + $0x30] sm:$0xff] %v694_v47  ;;  %v685_v6 = vadd.f32 %v1281_v18, %v662_v58  ;;  %v700_v9 = vmax.f32 %v684_v2, 0.0  ;;  %v747_v12 = vmul.f32 %v694_v47, %v694_v47 }
 0x144   : > { %v693_v42 = vmax.f32 %v677_v33, 0.0  ;;  %708 = vst [vmem:[%s1251_s15 + $0x20] sm:$0xff] %v692_v37  ;;  %v745_v54 = vmul.f32 %v692_v37, %v692_v37  ;;  %v759_v3 = vadd.f32 %v758_v59, %v744_v51  ;;  %v723_v4 = vadd.f32 %v722_v60, %v692_v37 }
 0x145   : > { %711 = vst [vmem:[%s1251_s15 + $0x38] sm:$0xff] %v695_v52  ;;  %v701_v13 = vmax.f32 %v685_v6, 0.0  ;;  %716 = vst [vmem:[%s1251_s15 + $0x60] sm:$0xff] %v700_v9  ;;  %v687_v15 = vadd.f32 %v1281_v18, %v664_v8  ;;  %v748_v19 = vmul.f32 %v695_v52, %v695_v52  ;;  %v702_v20 = vmax.f32 %v686_v14, 0.0 }
 0x146   : > { %709 = vst [vmem:[%s1251_s15 + $0x28] sm:$0xff] %v693_v42  ;;  %v746_v61 = vmul.f32 %v693_v42, %v693_v42  ;;  %v760_v10 = vadd.f32 %v759_v3, %v745_v54  ;;  %v724_v11 = vadd.f32 %v723_v4, %v693_v42  ;;  %v750_v27 = vmul.f32 %v697_v0, %v697_v0 }
 0x147   : > { %717 = vst [vmem:[%s1251_s15 + $0x68] sm:$0xff] %v701_v13  ;;  %v703_v21 = vmax.f32 %v687_v15, 0.0  ;;  %718 = vst [vmem:[%s1251_s15 + $0x70] sm:$0xff] %v702_v20  ;;  %v751_v30 = vmul.f32 %v698_v1, %v698_v1  ;;  %v752_v18 = vmul.f32 %v699_v5, %v699_v5  ;;  %v753_v35 = vmul.f32 %v700_v9, %v700_v9 }
 0x148   : > { %v761_v16 = vadd.f32 %v760_v10, %v746_v61  ;;  %v725_v17 = vadd.f32 %v724_v11, %v694_v47  ;;  %v754_v38 = vmul.f32 %v701_v13, %v701_v13  ;;  %v755_v41 = vmul.f32 %v702_v20, %v702_v20 }
 0x149   : > { %719 = vst [vmem:[%s1251_s15 + $0x78] sm:$0xff] %v703_v21  ;;  %v756_v44 = vmul.f32 %v703_v21, %v703_v21 }
 0x14a   : > { %v762_v22 = vadd.f32 %v761_v16, %v747_v12  ;;  %v726_v23 = vadd.f32 %v725_v17, %v695_v52 }
 0x14c   : > { %v763_v25 = vadd.f32 %v762_v22, %v748_v19  ;;  %v727_v26 = vadd.f32 %v726_v23, %v696_v63 }
 0x14e   : > { %v764_v28 = vadd.f32 %v763_v25, %v749_v24  ;;  %v728_v29 = vadd.f32 %v727_v26, %v697_v0 }
 0x150   : > { %v765_v31 = vadd.f32 %v764_v28, %v750_v27  ;;  %v729_v32 = vadd.f32 %v728_v29, %v698_v1 }
 0x152   : > { %v766_v33 = vadd.f32 %v765_v31, %v751_v30  ;;  %v730_v34 = vadd.f32 %v729_v32, %v699_v5 }
 0x154   : > { %v767_v36 = vadd.f32 %v766_v33, %v752_v18  ;;  %v731_v37 = vadd.f32 %v730_v34, %v700_v9 }
 0x156   : > { %v768_v39 = vadd.f32 %v767_v36, %v753_v35  ;;  %v732_v40 = vadd.f32 %v731_v37, %v701_v13 }
 0x158   : > { %v769_v42 = vadd.f32 %v768_v39, %v754_v38  ;;  %v733_v43 = vadd.f32 %v732_v40, %v702_v20 }
 0x15a   : > { %v770_v45 = vadd.f32 %v769_v42, %v755_v41  ;;  %v734_v46 = vadd.f32 %v733_v43, %v703_v21 }
 0x15c   : > { %v735_v47 = vrot.slane %v734_v46, 4  ;;  %v771_v48 = vadd.f32 %v770_v45, %v756_v44 }
 0x15e   : > { %v736_v49 = vadd.f32 %v735_v47, %v734_v46  ;;  %v772_v50 = vrot.slane %v771_v48, 4 }
 0x160   : > { %v737_v51 = vrot.slane %v736_v49, 2  ;;  %v773_v52 = vadd.f32 %v772_v50, %v771_v48 }
 0x162   : > { %v738_v53 = vadd.f32 %v737_v51, %v736_v49  ;;  %v774_v54 = vrot.slane %v773_v52, 2 }
 0x164   : > { %v739_v55 = vrot.slane %v738_v53, 1  ;;  %v775_v56 = vadd.f32 %v774_v54, %v773_v52 }
 0x166   : > { %v740_v57 = vadd.f32 %v739_v55, %v738_v53  ;;  %v776_v58 = vrot.slane %v775_v56, 1 }
 0x168   : > { %v777_v59 = vadd.f32 %v776_v58, %v775_v56 }
 0x16a   : > { %v779_v60 = vsel %vm778_vm0, %v740_v57, %v777_v59 }
 0x16b   : > { %v781_v61 = vsel %vm780_vm1, %v779_v60, 0.0 }
 0x16c   : > { %782 = vst [vmem:[%s1256_s10] sm:$0xff] %v781_v61 }
 0x16d PF: > { %s15_s21 = sadd.s32 1, %s1130_s21   ;;  %s1342_s15 = smov %s1110_s16 }
 0x16e   : > { %p12_p1 = scmp.ge.s32.totalorder %s15_s21, 6   ;;  %s1343_s16 = smov %s1209_s28 }
 0x16f   : > { %s1344_s17 = smov %s1122_s19  ;;  %s1345_s18 = smov %s1126_s20 }
 0x170   : > { %s1346_s19 = smov %s1349_s22  ;;  %s1347_s20 = smov %s1353_s23 }
 0x171   :  { %14 = sbr.rel (!%p12_p1) target bundleno = 4 (0x4), region = 131 }

// kernel: gcnv_forward.9
= control target key start
LH: loop header
LB: loop body
LE: loop exit
PB: predicated region body
PF: predicated region fallthrough
CT: control target
= control target key end

     0   :  { %s357_s12 = smov 0   ;;  %s434_s0 = inlined_call_operand.vmem [shape: f32[256,128], index: 0, kind: input, shape index: {}]   ;;  %s435_s1 = inlined_call_operand.vmem [shape: f32[1,128], index: 1, kind: input, shape index: {}]   ;;  %s436_s2 = inlined_call_operand.vmem [shape: f32[1,128], index: 2, kind: input, shape index: {}]   ;;  %s437_s3 = inlined_call_operand.vmem [shape: f32[256,128], index: 3, kind: output, shape index: {}]  }
   0x1 LB: > { %s308_s13 = sadd.s32 4294967295, %s335_s12   ;;  %p312_p0 = scmp.ge.s32.totalorder %s335_s12, 1  ;;  %s335_s12 = sphi %s357_s12, %s13_s12  }
   0x2   : > { %p138_p1 = scmp.lt.s32.totalorder %s335_s12, 3 }
   0x4   : > { %p139_p2 = pnand %p312_p0, %p138_p1 }
   0x5   : > { %s313_s14 = sshll.u32 (!%p139_p2), %s308_s13, 4  ;;  %v317_v0 = vld [vmem:[%s435_s1] ss:$0 sm:$0xff] (!%p139_p2) }
   0x6   : > { %142 = sbr.rel (%p139_p2) target bundleno = 30 (0x1e), region = 32  ;;  %p163_p3 = scmp.lt.s32.totalorder (!%p139_p2), %s313_s14, 31  ;;  %v376_v1 = vld [vmem:[%s436_s2] ss:$0 sm:$0xff] (!%p139_p2) }
   0xd   : > { %s439_s14 = smov (!%p163_p3, %s313_s14), 31 }
   0xe   : > { %s314_s15 = sshll.u32 %s439_s14, 3 }
   0xf   : > { %s371_s20 = scalar_lea.vmem %s434_s0, %s314_s15  ;;  %s387_s25 = scalar_lea.vmem %s437_s3, %s314_s15 }
  0x10   : > { %v174_v2 = vld [vmem:[%s371_s20] sm:$0xff]  ;;  %v175_v3 = vld [vmem:[%s371_s20 + $0x8] sm:$0xff]  ;;  %v176_v4 = vld [vmem:[%s371_s20 + $0x10] sm:$0xff] }
  0x11   : > { %v197_v5 = vmul.f32 %v317_v0, %v174_v2  ;;  %v198_v6 = vmul.f32 %v317_v0, %v175_v3  ;;  %v199_v7 = vmul.f32 %v317_v0, %v176_v4  ;;  %v177_v8 = vld [vmem:[%s371_s20 + $0x18] sm:$0xff]  ;;  %v178_v9 = vld [vmem:[%s371_s20 + $0x20] sm:$0xff]  ;;  %v179_v10 = vld [vmem:[%s371_s20 + $0x28] sm:$0xff] }
  0x12   : > { %v200_v11 = vmul.f32 %v317_v0, %v177_v8  ;;  %v201_v12 = vmul.f32 %v317_v0, %v178_v9  ;;  %v202_v13 = vmul.f32 %v317_v0, %v179_v10  ;;  %v180_v14 = vld [vmem:[%s371_s20 + $0x30] sm:$0xff]  ;;  %v181_v15 = vld [vmem:[%s371_s20 + $0x38] sm:$0xff]  ;;  %v182_v16 = vld [vmem:[%s371_s20 + $0x40] sm:$0xff] }
  0x13   : > { %v220_v17 = vadd.f32 %v376_v1, %v197_v5  ;;  %v221_v18 = vadd.f32 %v376_v1, %v198_v6  ;;  %v222_v19 = vadd.f32 %v376_v1, %v199_v7  ;;  %v203_v20 = vmul.f32 %v317_v0, %v180_v14  ;;  %v183_v21 = vld [vmem:[%s371_s20 + $0x48] sm:$0xff]  ;;  %v184_v22 = vld [vmem:[%s371_s20 + $0x50] sm:$0xff]  ;;  %v185_v23 = vld [vmem:[%s371_s20 + $0x58] sm:$0xff] }
  0x14   : > { %v223_v24 = vadd.f32 %v376_v1, %v200_v11  ;;  %v224_v25 = vadd.f32 %v376_v1, %v201_v12  ;;  %v225_v26 = vadd.f32 %v376_v1, %v202_v13  ;;  %v204_v27 = vmul.f32 %v317_v0, %v181_v15  ;;  %v186_v28 = vld [vmem:[%s371_s20 + $0x60] sm:$0xff]  ;;  %v187_v29 = vld [vmem:[%s371_s20 + $0x68] sm:$0xff]  ;;  %v188_v30 = vld [vmem:[%s371_s20 + $0x70] sm:$0xff] }
  0x15   : > { %236 = vst [vmem:[%s387_s25] sm:$0xff] %v220_v17  ;;  %237 = vst [vmem:[%s387_s25 + $0x8] sm:$0xff] %v221_v18  ;;  %v226_v31 = vadd.f32 %v376_v1, %v203_v20  ;;  %v205_v32 = vmul.f32 %v317_v0, %v182_v16  ;;  %v206_v33 = vmul.f32 %v317_v0, %v183_v21  ;;  %v189_v35 = vld [vmem:[%s371_s20 + $0x78] sm:$0xff] }
  0x16   : > { %238 = vst [vmem:[%s387_s25 + $0x10] sm:$0xff] %v222_v19  ;;  %v207_v34 = vmul.f32 %v317_v0, %v184_v22  ;;  %239 = vst [vmem:[%s387_s25 + $0x18] sm:$0xff] %v223_v24  ;;  %v227_v36 = vadd.f32 %v376_v1, %v204_v27  ;;  %v208_v37 = vmul.f32 %v317_v0, %v185_v23 }
  0x17   : > { %240 = vst [vmem:[%s387_s25 + $0x20] sm:$0xff] %v224_v25  ;;  %241 = vst [vmem:[%s387_s25 + $0x28] sm:$0xff] %v225_v26  ;;  %v209_v38 = vmul.f32 %v317_v0, %v186_v28  ;;  %v210_v39 = vmul.f32 %v317_v0, %v187_v29  ;;  %v228_v40 = vadd.f32 %v376_v1, %v205_v32 }
  0x18   : > { %242 = vst [vmem:[%s387_s25 + $0x30] sm:$0xff] %v226_v31  ;;  %v229_v41 = vadd.f32 %v376_v1, %v206_v33  ;;  %v230_v42 = vadd.f32 %v376_v1, %v207_v34  ;;  %v211_v43 = vmul.f32 %v317_v0, %v188_v30  ;;  %243 = vst [vmem:[%s387_s25 + $0x38] sm:$0xff] %v227_v36 }
  0x19   : > { %v231_v44 = vadd.f32 %v376_v1, %v208_v37  ;;  %v232_v45 = vadd.f32 %v376_v1, %v209_v38  ;;  %v233_v46 = vadd.f32 %v376_v1, %v210_v39  ;;  %v212_v47 = vmul.f32 %v317_v0, %v189_v35  ;;  %244 = vst [vmem:[%s387_s25 + $0x40] sm:$0xff] %v228_v40 }
  0x1a   : > { %245 = vst [vmem:[%s387_s25 + $0x48] sm:$0xff] %v229_v41  ;;  %246 = vst [vmem:[%s387_s25 + $0x50] sm:$0xff] %v230_v42  ;;  %v234_v48 = vadd.f32 %v376_v1, %v211_v43 }
  0x1b   : > { %247 = vst [vmem:[%s387_s25 + $0x58] sm:$0xff] %v231_v44  ;;  %248 = vst [vmem:[%s387_s25 + $0x60] sm:$0xff] %v232_v45  ;;  %v235_v49 = vadd.f32 %v376_v1, %v212_v47 }
  0x1c   : > { %249 = vst [vmem:[%s387_s25 + $0x68] sm:$0xff] %v233_v46  ;;  %250 = vst [vmem:[%s387_s25 + $0x70] sm:$0xff] %v234_v48 }
  0x1d   : > { %251 = vst [vmem:[%s387_s25 + $0x78] sm:$0xff] %v235_v49 }
  0x1e PF: > { %s13_s12 = sadd.s32 1, %s335_s12  }
  0x1f   : > { %p10_p4 = scmp.ge.s32.totalorder %s13_s12, 4  }
  0x21   :  { %12 = sbr.rel (!%p10_p4) target bundleno = 1 (0x1), region = 62 }

// kernel: gcnv_forward.10
= control target key start
LH: loop header
LB: loop body
LE: loop exit
PB: predicated region body
PF: predicated region fallthrough
CT: control target
= control target key end

     0   :  { %s757_s12 = smov 0   ;;  %s857_s0 = inlined_call_operand.vmem [shape: f32[256,128], index: 0, kind: input, shape index: {}]   ;;  %s858_s1 = inlined_call_operand.vmem [shape: f32[128,128], index: 1, kind: input, shape index: {}]   ;;  %s859_s2 = inlined_call_operand.vmem [shape: f32[1,128], index: 2, kind: input, shape index: {}]   ;;  %s860_s3 = inlined_call_operand.vmem [shape: bf16[256,128], index: 3, kind: output, shape index: {}]  }
   0x1 LB: > { %s494_s13 = sadd.s32 4294967295, %s735_s12   ;;  %p498_p0 = scmp.ge.s32.totalorder %s735_s12, 1  ;;  %s735_s12 = sphi %s757_s12, %s13_s12  }
   0x2   : > { %p138_p1 = scmp.lt.s32.totalorder %s735_s12, 3 }
   0x4   : > { %p139_p2 = pnand %p498_p0, %p138_p1 }
   0x5   : > { %v190_v0 = vld [vmem:[%s858_s1] sm:$0xff] (!%p139_p2)  ;;  %v191_v1 = vld [vmem:[%s858_s1 + $0x8] sm:$0xff] (!%p139_p2)  ;;  %v192_v2 = vld [vmem:[%s858_s1 + $0x10] sm:$0xff] (!%p139_p2)  ;;  %s499_s20 = sshll.u32 (!%p139_p2), %s494_s13, 4 }
   0x6   : > { %142 = sbr.rel (%p139_p2) target bundleno = 271 (0x10f), region = 32  ;;  %v673_v3 = vpack.c.bf16 (!%p139_p2), %v191_v1, %v190_v0  ;;  %v193_v4 = vld [vmem:[%s858_s1 + $0x18] sm:$0xff] (!%p139_p2)  ;;  %p163_p3 = scmp.lt.s32.totalorder (!%p139_p2), %s499_s20, 31  ;;  %v194_v6 = vld [vmem:[%s858_s1 + $0x20] sm:$0xff] (!%p139_p2)  ;;  %v195_v7 = vld [vmem:[%s858_s1 + $0x28] sm:$0xff] (!%p139_p2) }
   0x7   : > { %v677_v5 = vpack.c.bf16 (!%p139_p2), %v193_v4, %v192_v2  ;;  %v681_v8 = vpack.c.bf16 (!%p139_p2), %v195_v7, %v194_v6  ;;  %v196_v9 = vld [vmem:[%s858_s1 + $0x30] sm:$0xff] (!%p139_p2)  ;;  %v197_v10 = vld [vmem:[%s858_s1 + $0x38] sm:$0xff] (!%p139_p2)  ;;  %v198_v14 = vld [vmem:[%s858_s1 + $0x40] sm:$0xff] (!%p139_p2) }
   0x8   : > { %674 = vmatprep.subr.bf16.mxu0 (!%p139_p2), %v673_v3  ;;  %705 = vmatprep.subr.bf16.mxu1 (!%p139_p2), %v673_v3  ;;  %v685_v13 = vpack.c.bf16 (!%p139_p2), %v197_v10, %v196_v9  ;;  %v199_v15 = vld [vmem:[%s858_s1 + $0x48] sm:$0xff] (!%p139_p2)  ;;  %v200_v17 = vld [vmem:[%s858_s1 + $0x50] sm:$0xff] (!%p139_p2)  ;;  %v201_v18 = vld [vmem:[%s858_s1 + $0x58] sm:$0xff] (!%p139_p2) }
   0x9   : > { %676 = vmatpush3.bf16.msra.mxu0 (!%p139_p2), %v673_v3  ;;  %713 = vmatpush3.bf16.msra.mxu1 (!%p139_p2), %v673_v3  ;;  %v689_v16 = vpack.c.bf16 (!%p139_p2), %v199_v15, %v198_v14  ;;  %v693_v19 = vpack.c.bf16 (!%p139_p2), %v201_v18, %v200_v17  ;;  %v202_v20 = vld [vmem:[%s858_s1 + $0x60] sm:$0xff] (!%p139_p2)  ;;  %v203_v21 = vld [vmem:[%s858_s1 + $0x68] sm:$0xff] (!%p139_p2)  ;;  %v204_v23 = vld [vmem:[%s858_s1 + $0x70] sm:$0xff] (!%p139_p2) }
   0xa   : > { %678 = vmatprep.subr.bf16.mxu0 (!%p139_p2), %v677_v5  ;;  %706 = vmatprep.subr.bf16.mxu1 (!%p139_p2), %v677_v5  ;;  %v697_v22 = vpack.c.bf16 (!%p139_p2), %v203_v21, %v202_v20  ;;  %v205_v24 = vld [vmem:[%s858_s1 + $0x78] sm:$0xff] (!%p139_p2)  ;;  %v503_v40 = vld [vmem:[%s859_s2] ss:$0 sm:$0xff] (!%p139_p2) }
   0xb   : > { %v701_v25 = vpack.c.bf16 (!%p139_p2), %v205_v24, %v204_v23 }
   0xd   : > { %s862_s20 = smov (!%p163_p3, %s499_s20), 31  ;;  %680 = vmatpush3.bf16.msra.mxu0 %v677_v5  ;;  %714 = vmatpush3.bf16.msra.mxu1 %v677_v5 }
   0xe   : > { %s500_s27 = sshll.u32 %s862_s20, 3  ;;  %682 = vmatprep.subr.bf16.mxu0 %v681_v8  ;;  %707 = vmatprep.subr.bf16.mxu1 %v681_v8  ;;  %s502_s28 = sshll.u32 %s862_s20, 2 }
   0xf   : > { %s795_s7 = scalar_lea.vmem %s857_s0, %s500_s27  ;;  %s844_s4 = scalar_lea.vmem %s860_s3, %s502_s28 }
  0x10   : > { %v174_v11 = vld [vmem:[%s795_s7] sm:$0xff]  ;;  %v175_v26 = vld [vmem:[%s795_s7 + $0x8] sm:$0xff]  ;;  %v176_v28 = vld [vmem:[%s795_s7 + $0x10] sm:$0xff] }
  0x11   : > { %v182_v12 = vld [vmem:[%s795_s7 + $0x40] sm:$0xff]  ;;  %649 = vmatprep.mubr.f32.mxu0 %v174_v11  ;;  %684 = vmatpush3.bf16.msra.mxu0 %v681_v8  ;;  %v183_v27 = vld [vmem:[%s795_s7 + $0x48] sm:$0xff]  ;;  %v184_v29 = vld [vmem:[%s795_s7 + $0x50] sm:$0xff] }
  0x12   : > { %661 = vmatprep.mubr.f32.mxu1 %v182_v12  ;;  %715 = vmatpush3.bf16.msra.mxu1 %v681_v8  ;;  %v177_v30 = vld [vmem:[%s795_s7 + $0x18] sm:$0xff]  ;;  %v178_v32 = vld [vmem:[%s795_s7 + $0x20] sm:$0xff]  ;;  %v179_v34 = vld [vmem:[%s795_s7 + $0x28] sm:$0xff] }
  0x13   : > { %686 = vmatprep.subr.bf16.mxu0 %v685_v13  ;;  %708 = vmatprep.subr.bf16.mxu1 %v685_v13  ;;  %v185_v31 = vld [vmem:[%s795_s7 + $0x58] sm:$0xff]  ;;  %v186_v33 = vld [vmem:[%s795_s7 + $0x60] sm:$0xff]  ;;  %v187_v35 = vld [vmem:[%s795_s7 + $0x68] sm:$0xff] }
  0x14   : > { %v180_v36 = vld [vmem:[%s795_s7 + $0x30] sm:$0xff]  ;;  %v181_v38 = vld [vmem:[%s795_s7 + $0x38] sm:$0xff] }
  0x15   : > { %688 = vmatpush3.bf16.msra.mxu0 %v685_v13  ;;  %v188_v37 = vld [vmem:[%s795_s7 + $0x70] sm:$0xff]  ;;  %v189_v39 = vld [vmem:[%s795_s7 + $0x78] sm:$0xff] }
  0x16   : > { %716 = vmatpush3.bf16.msra.mxu1 %v685_v13  ;;  %690 = vmatprep.subr.bf16.mxu0 %v689_v16 }
  0x17   : > { %709 = vmatprep.subr.bf16.mxu1 %v689_v16 }
  0x19   : > { %692 = vmatpush3.bf16.msra.mxu0 %v689_v16 }
  0x1a   : > { %717 = vmatpush3.bf16.msra.mxu1 %v689_v16  ;;  %694 = vmatprep.subr.bf16.mxu0 %v693_v19 }
  0x1b   : > { %710 = vmatprep.subr.bf16.mxu1 %v693_v19 }
  0x1d   : > { %696 = vmatpush3.bf16.msra.mxu0 %v693_v19 }
  0x1e   : > { %718 = vmatpush3.bf16.msra.mxu1 %v693_v19  ;;  %698 = vmatprep.subr.bf16.mxu0 %v697_v22 }
  0x1f   : > { %711 = vmatprep.subr.bf16.mxu1 %v697_v22 }
  0x21   : > { %700 = vmatpush3.bf16.msra.mxu0 %v697_v22 }
  0x22   : > { %719 = vmatpush3.bf16.msra.mxu1 %v697_v22  ;;  %702 = vmatprep.subr.bf16.mxu0 %v701_v25 }
  0x23   : > { %712 = vmatprep.subr.bf16.mxu1 %v701_v25 }
  0x25   : > { %704 = vmatpush3.bf16.msra.mxu0 %v701_v25 }
  0x26   : > { %720 = vmatpush3.bf16.msra.mxu1 %v701_v25 }
  0x28   : > { %650 = vmatmul.mubr.f32.vlgmr.msra.gmra.mrb[0].mxu0 %v175_v26 }
  0x29   : > { %662 = vmatmul.mubr.f32.vlgmr.msra.gmra.mrb[0].mxu1 %v183_v27  ;;  %652 = vmatprep.mubr.f32.mxu0 %v176_v28 }
  0x2a   : > { %664 = vmatprep.mubr.f32.mxu1 %v184_v29 }
  0x2c   : > { %653 = vmatmul.mubr.f32.gmra.mrb[2].mxu0 %v177_v30 }
  0x2d   : > { %665 = vmatmul.mubr.f32.gmra.mrb[2].mxu1 %v185_v31  ;;  %655 = vmatprep.mubr.f32.mxu0 %v178_v32 }
  0x2e   : > { %667 = vmatprep.mubr.f32.mxu1 %v186_v33 }
  0x30   : > { %656 = vmatmul.mubr.f32.gmra.mrb[4].mxu0 %v179_v34 }
  0x31   : > { %668 = vmatmul.mubr.f32.gmra.mrb[4].mxu1 %v187_v35  ;;  %658 = vmatprep.mubr.f32.mxu0 %v180_v36 }
  0x32   : > { %670 = vmatprep.mubr.f32.mxu1 %v188_v37 }
  0x34   : > { %659 = vmatmul.mubr.f32.gmra.mrb[6].mxu0 %v181_v38 }
  0x35   : > { %671 = vmatmul.mubr.f32.gmra.mrb[6].mxu1 %v189_v39 }
  0xfb   : > { %v651_v41 = vpop.f32.mrb[0].mxu0 }
  0xfc   : > { %v663_v42 = vpop.f32.mrb[0].mxu1  ;;  %v285_v43 = vadd.f32 %v651_v41, %v503_v40  ;;  %v279_v45 = vpop.f32.mrb[1].mxu0 }
  0xfd   : > { %v325_v44 = vadd.f32 %v663_v42, %v503_v40  ;;  %v319_v46 = vpop.f32.mrb[1].mxu1  ;;  %v280_v47 = vadd.f32 %v503_v40, %v279_v45 }
  0xfe   : > { %v320_v48 = vadd.f32 %v503_v40, %v319_v46 }
  0xff   : > { %v541_v49 = vpack.c.bf16 %v285_v43, %v280_v47  ;;  %v654_v51 = vpop.f32.mrb[2].mxu0 }
 0x100   : > { %v561_v50 = vpack.c.bf16 %v325_v44, %v320_v48  ;;  %v666_v52 = vpop.f32.mrb[2].mxu1  ;;  %v295_v53 = vadd.f32 %v654_v51, %v503_v40  ;;  %v289_v55 = vpop.f32.mrb[3].mxu0 }
 0x101   : > { %v335_v54 = vadd.f32 %v666_v52, %v503_v40  ;;  %v329_v56 = vpop.f32.mrb[3].mxu1  ;;  %542 = vst [vmem:[%s844_s4] sm:$0xff] %v541_v49   ;;  %v290_v57 = vadd.f32 %v503_v40, %v289_v55 }
 0x102   : > { %581 = vst [vmem:[%s844_s4 + $0x20] sm:$0xff] %v561_v50   ;;  %v330_v58 = vadd.f32 %v503_v40, %v329_v56 }
 0x103   : > { %v546_v59 = vpack.c.bf16 %v295_v53, %v290_v57  ;;  %v657_v61 = vpop.f32.mrb[4].mxu0 }
 0x104   : > { %v566_v60 = vpack.c.bf16 %v335_v54, %v330_v58  ;;  %v669_v62 = vpop.f32.mrb[4].mxu1  ;;  %v305_v63 = vadd.f32 %v657_v61, %v503_v40  ;;  %v299_v1 = vpop.f32.mrb[5].mxu0 }
 0x105   : > { %v345_v0 = vadd.f32 %v669_v62, %v503_v40  ;;  %v339_v2 = vpop.f32.mrb[5].mxu1  ;;  %578 = vst [vmem:[%s844_s4 + $0x8] sm:$0xff] %v546_v59   ;;  %v300_v3 = vadd.f32 %v503_v40, %v299_v1 }
 0x106   : > { %582 = vst [vmem:[%s844_s4 + $0x28] sm:$0xff] %v566_v60   ;;  %v340_v4 = vadd.f32 %v503_v40, %v339_v2 }
 0x107   : > { %v551_v5 = vpack.c.bf16 %v305_v63, %v300_v3  ;;  %v660_v7 = vpop.f32.mrb[6].mxu0 }
 0x108   : > { %v571_v6 = vpack.c.bf16 %v345_v0, %v340_v4  ;;  %v672_v8 = vpop.f32.mrb[6].mxu1  ;;  %v315_v9 = vadd.f32 %v660_v7, %v503_v40  ;;  %v309_v11 = vpop.f32.mrb[7].mxu0 }
 0x109   : > { %v355_v10 = vadd.f32 %v672_v8, %v503_v40  ;;  %v349_v12 = vpop.f32.mrb[7].mxu1  ;;  %579 = vst [vmem:[%s844_s4 + $0x10] sm:$0xff] %v551_v5   ;;  %v310_v13 = vadd.f32 %v503_v40, %v309_v11 }
 0x10a   : > { %583 = vst [vmem:[%s844_s4 + $0x30] sm:$0xff] %v571_v6   ;;  %v350_v14 = vadd.f32 %v503_v40, %v349_v12 }
 0x10b   : > { %v556_v15 = vpack.c.bf16 %v315_v9, %v310_v13 }
 0x10c   : > { %v576_v16 = vpack.c.bf16 %v355_v10, %v350_v14 }
 0x10d   : > { %580 = vst [vmem:[%s844_s4 + $0x18] sm:$0xff] %v556_v15  }
 0x10e   : > { %584 = vst [vmem:[%s844_s4 + $0x38] sm:$0xff] %v576_v16  }
 0x10f PF: > { %s13_s12 = sadd.s32 1, %s735_s12  }
 0x110   : > { %p10_p4 = scmp.ge.s32.totalorder %s13_s12, 4  }
 0x112   :  { %12 = sbr.rel (!%p10_p4) target bundleno = 1 (0x1), region = 62 }

// kernel: gcnv_forward.13
= control target key start
LH: loop header
LB: loop body
LE: loop exit
PB: predicated region body
PF: predicated region fallthrough
CT: control target
= control target key end

     0   :  { %s395_s9 = smov 0   ;;  %s462_s0 = inlined_call_operand.vmem [shape: f32[8,256], index: 0, kind: input, shape index: {}]   ;;  %s463_s1 = inlined_call_operand.vmem [shape: f32[256,256], index: 1, kind: input, shape index: {}]   ;;  %s464_s2 = inlined_call_operand.vmem [shape: f32[8,256], index: 2, kind: output, shape index: {}]  }
   0x1 LB: > { %s401_s10 = sadd.s32 4294967295, %s376_s9   ;;  %p318_p0 = scmp.ge.s32.totalorder %s376_s9, 1  ;;  %s376_s9 = sphi %s395_s9, %s12_s9  }
   0x2   : > { %p118_p1 = scmp.lt.s32.totalorder %s376_s9, 3 }
   0x4   : > { %p119_p2 = pnand %p318_p0, %p118_p1 }
   0x5   : > { %p140_p3 = scmp.lt.s32.totalorder (!%p119_p2), %s401_s10, 1  ;;  %s320_s11 = sshll.u32 (!%p119_p2), %s401_s10, 4 }
   0x6   : > { %122 = sbr.rel (%p119_p2) target bundleno = 280 (0x118), region = 28  ;;  %p145_p4 = scmp.lt.s32.totalorder (!%p119_p2), %s320_s11, 31 }
   0x7   : > { %p323_p5 = scmp.ne.s32.totalorder (!%p119_p2), %s401_s10, 0 }
   0xd   : > { %s141_s12 = scalar_select %p140_p3, %s401_s10, 1 }
   0xe   : > { %s466_s11 = smov (!%p145_p4, %s320_s11), 31  ;;  %154 = sbr.rel (%p323_p5) target bundleno = 21 (0x15), region = 32 }
   0xf   : > { %s319_s13 = sshll.u32 %s141_s12, 3  ;;  %s327_s17 = sshll.u32 %s466_s11, 4  ;;  %v378_v0 = vmov (!%p323_p5), 0.0  }
  0x10   : > { %s411_s16 = scalar_lea.vmem %s462_s0, %s319_s13  ;;  %s416_s20 = scalar_lea.vmem %s463_s1, %s327_s17  ;;  %155 = vst [vmem:[#allocation2] sm:$0xff] (!%p323_p5), %v378_v0  ;;  %156 = vst [vmem:[#allocation2 + $0x8] sm:$0xff] (!%p323_p5), %v378_v0 }
  0x15 PF: > { %v161_v1 = vld [vmem:[%s416_s20 + $0x8] sm:$0xff]  ;;  %v163_v2 = vld [vmem:[%s416_s20 + $0x18] sm:$0xff]  ;;  %v160_v3 = vld [vmem:[%s416_s20] sm:$0xff]  ;;  %v379_v8 = vmov 0.0   ;;  %p324_p6 = scmp.ne.s32.totalorder %s401_s10, 1 }
  0x16   : > { %v328_v4 = vpack.c.bf16 %v163_v2, %v161_v1  ;;  %v162_v5 = vld [vmem:[%s416_s20 + $0x10] sm:$0xff]  ;;  %v165_v6 = vld [vmem:[%s416_s20 + $0x28] sm:$0xff]  ;;  %v167_v7 = vld [vmem:[%s416_s20 + $0x38] sm:$0xff]  ;;  %256 = vmatprep.mubr.f32.mxu0 %v379_v8 }
  0x17   : > { %v330_v9 = vpack.c.bf16 %v162_v5, %v160_v3  ;;  %v332_v10 = vpack.c.bf16 %v167_v7, %v165_v6  ;;  %v164_v11 = vld [vmem:[%s416_s20 + $0x20] sm:$0xff]  ;;  %v166_v12 = vld [vmem:[%s416_s20 + $0x30] sm:$0xff]  ;;  %v169_v13 = vld [vmem:[%s416_s20 + $0x48] sm:$0xff] }
  0x18   : > { %329 = vmatprep.subr.bf16.mxu0 %v328_v4  ;;  %v171_v14 = vld [vmem:[%s416_s20 + $0x58] sm:$0xff]  ;;  %v334_v15 = vpack.c.bf16 %v166_v12, %v164_v11  ;;  %v168_v17 = vld [vmem:[%s416_s20 + $0x40] sm:$0xff]  ;;  %v170_v18 = vld [vmem:[%s416_s20 + $0x50] sm:$0xff] }
  0x19   : > { %331 = vmatpush1.bf16.msra.mxu0 %v330_v9  ;;  %v336_v16 = vpack.c.bf16 %v171_v14, %v169_v13  ;;  %v173_v19 = vld [vmem:[%s416_s20 + $0x68] sm:$0xff]  ;;  %v175_v20 = vld [vmem:[%s416_s20 + $0x78] sm:$0xff]  ;;  %v338_v21 = vpack.c.bf16 %v170_v18, %v168_v17  ;;  %v172_v23 = vld [vmem:[%s416_s20 + $0x60] sm:$0xff] }
  0x1a   : > { %333 = vmatprep.subr.bf16.mxu0 %v332_v10  ;;  %v340_v22 = vpack.c.bf16 %v175_v20, %v173_v19  ;;  %v174_v24 = vld [vmem:[%s416_s20 + $0x70] sm:$0xff]  ;;  %v177_v25 = vld [vmem:[%s416_s20 + $0x88] sm:$0xff]  ;;  %v179_v26 = vld [vmem:[%s416_s20 + $0x98] sm:$0xff] }
  0x1b   : > { %v342_v27 = vpack.c.bf16 %v174_v24, %v172_v23  ;;  %v344_v28 = vpack.c.bf16 %v179_v26, %v177_v25  ;;  %v176_v29 = vld [vmem:[%s416_s20 + $0x80] sm:$0xff]  ;;  %v178_v30 = vld [vmem:[%s416_s20 + $0x90] sm:$0xff]  ;;  %v181_v31 = vld [vmem:[%s416_s20 + $0xa8] sm:$0xff] }
  0x1c   : > { %v183_v32 = vld [vmem:[%s416_s20 + $0xb8] sm:$0xff]  ;;  %v346_v33 = vpack.c.bf16 %v178_v30, %v176_v29  ;;  %v180_v35 = vld [vmem:[%s416_s20 + $0xa0] sm:$0xff]  ;;  %v182_v36 = vld [vmem:[%s416_s20 + $0xb0] sm:$0xff] }
  0x1d   : > { %335 = vmatpush1.bf16.msra.mxu0 %v334_v15  ;;  %v348_v34 = vpack.c.bf16 %v183_v32, %v181_v31  ;;  %v185_v37 = vld [vmem:[%s416_s20 + $0xc8] sm:$0xff]  ;;  %v187_v38 = vld [vmem:[%s416_s20 + $0xd8] sm:$0xff]  ;;  %v350_v39 = vpack.c.bf16 %v182_v36, %v180_v35  ;;  %v184_v41 = vld [vmem:[%s416_s20 + $0xc0] sm:$0xff] }
  0x1e   : > { %337 = vmatprep.subr.bf16.mxu0 %v336_v16  ;;  %v352_v40 = vpack.c.bf16 %v187_v38, %v185_v37  ;;  %v186_v42 = vld [vmem:[%s416_s20 + $0xd0] sm:$0xff]  ;;  %v189_v43 = vld [vmem:[%s416_s20 + $0xe8] sm:$0xff]  ;;  %v191_v44 = vld [vmem:[%s416_s20 + $0xf8] sm:$0xff] }
  0x1f   : > { %v354_v45 = vpack.c.bf16 %v186_v42, %v184_v41  ;;  %v356_v46 = vpack.c.bf16 %v191_v44, %v189_v43  ;;  %v188_v47 = vld [vmem:[%s416_s20 + $0xe0] sm:$0xff]  ;;  %v190_v48 = vld [vmem:[%s416_s20 + $0xf0] sm:$0xff]  ;;  %v158_v52 = vld [vmem:[#allocation2 + $0x8] sm:$0xff] }
  0x20   : > { %v358_v49 = vpack.c.bf16 %v190_v48, %v188_v47  ;;  %v159_v50 = vld [vmem:[%s411_s16] sm:$0xff] }
  0x21   : > { %339 = vmatpush1.bf16.msra.mxu0 %v338_v21  ;;  %v157_v51 = vld [vmem:[#allocation2] sm:$0xff] }
  0x22   : > { %341 = vmatprep.subr.bf16.mxu0 %v340_v22 }
  0x25   : > { %343 = vmatpush1.bf16.msra.mxu0 %v342_v27 }
  0x26   : > { %345 = vmatprep.subr.bf16.mxu0 %v344_v28 }
  0x29   : > { %347 = vmatpush1.bf16.msra.mxu0 %v346_v33 }
  0x2a   : > { %349 = vmatprep.subr.bf16.mxu0 %v348_v34 }
  0x2d   : > { %351 = vmatpush1.bf16.msra.mxu0 %v350_v39 }
  0x2e   : > { %353 = vmatprep.subr.bf16.mxu0 %v352_v40 }
  0x31   : > { %355 = vmatpush1.bf16.msra.mxu0 %v354_v45 }
  0x32   : > { %357 = vmatprep.subr.bf16.mxu0 %v356_v46 }
  0x35   : > { %359 = vmatpush1.bf16.msra.mxu0 %v358_v49 }
  0x38   : > { %257 = vmatmul.mubr.f32.vlgmr.msra.gmra.mrb[0].mxu0 %v159_v50 }
 0x109   : > { %270 = sbr.rel (%p324_p6) target bundleno = 280 (0x118), region = 36 }
 0x10b   : > { %v258_v53 = vpop.f32.mrb[0].mxu0 }
 0x10c   : > { %v263_v54 = vadd.f32 %v258_v53, %v157_v51  ;;  %v260_v55 = vpop.f32.mrb[1].mxu0 }
 0x10d   : > { %v264_v56 = vadd.f32 %v260_v55, %v158_v52 }
 0x10e   : > { %265 = vst [vmem:[#allocation2] sm:$0xff] %v263_v54 }
 0x10f   : > { %266 = vst [vmem:[#allocation2 + $0x8] sm:$0xff] %v264_v56 }
 0x115   : > { %v271_v57 = vld [vmem:[#allocation2] sm:$0xff] }
 0x116   : > { %v272_v58 = vld [vmem:[#allocation2 + $0x8] sm:$0xff]  ;;  %273 = vst [vmem:[%s464_s2] sm:$0xff] %v271_v57 }
 0x117   : > { %274 = vst [vmem:[%s464_s2 + $0x8] sm:$0xff] %v272_v58 }
 0x118 PF: > { %s12_s9 = sadd.s32 1, %s376_s9  }
 0x119   : > { %p9_p7 = scmp.ge.s32.totalorder %s12_s9, 4  }
 0x11b   :  { %11 = sbr.rel (!%p9_p7) target bundleno = 1 (0x1), region = 65 }

</bundles_post_ra>
